<compile_context>
chip_gen: v7x
topology: tpu7x:2x2x1
jax: 0.10.0
libtpu: 0.0.40
codegen_flags: <defaults>
</compile_context>

<pallas_src>
import functools

import jax
import jax.numpy as jnp
from jax.experimental import pallas as pl
from jax.experimental.pallas import tpu as pltpu


def decoder_kernel(
    # step activations / state
    x0_ref,      # (Bp, E+H)   bf16   [embedded | hidden[0]]  (pre-concatenated, pre-cast)
    h_ref,       # (L, Bp, H)  f32
    c_ref,       # (L, Bp, H)  f32
    enc_ref,     # (Bp, S, 2H) bf16   encoder outputs (cast once per sequence)
    encp_ref,    # (Bp, S, H)  f32    enc @ Wa_e^T (step-invariant, precomputed)
    mask_ref,    # (Bp, S)     f32
    # packed / pre-transposed weights
    wa_hT_ref,   # (H, H)      bf16
    w0T_ref,     # (E+3H, 4H)  bf16   rows ordered [emb | h_prev0 | weighted]
    w1T_ref,     # (2H, 4H)    bf16   rows ordered [h0 | h_prev1]
    small_ref,   # (4, 4H)     f32    row0=b0  row1=b1  row2=[ba|va]  row3=[wp_o|wp_w|bp]
    woutT_ref,   # (3H, Vt)    bf16   one vocab tile of fc_out^T, rows [h1 | weighted]
    bout_ref,    # (1, Vt)     f32    one vocab tile of fc_out bias
    # outputs
    pred_ref,    # (Bp, Vt)
    h_out_ref,   # (L, Bp, H)
    c_out_ref,   # (L, Bp, H)
    pgen_ref,    # (Bp, 1)
    attn_ref,    # (Bp, S)
    # VMEM scratch persisting across the vocab-tile grid
    h1_sc,       # (Bp, H)   bf16
    w_sc,        # (Bp, 2H)  bf16
):
    j = pl.program_id(0)
    L, B, H = h_ref.shape
    EH = x0_ref.shape[1]
    f32, bf16 = jnp.float32, jnp.bfloat16

    # Attention + LSTM cell + pointer head run once (first vocab tile); the bf16 copies
    # of h1 / weighted needed by every vocab tile are stashed in VMEM scratch.
    @pl.when(j == 0)
    def _state_step():
        # ----------------------------- attention (f32 score) -----------------------------
        h_last = h_ref[L - 1]                                                  # (B, H)
        hid_part = jnp.dot(h_last.astype(bf16), wa_hT_ref[...],
                           preferred_element_type=f32)                         # (B, H)
        ba = small_ref[2:3, 0:H].reshape(1, 1, H)
        va = small_ref[2:3, H:2 * H].reshape(1, 1, H)
        energy = jnp.tanh(hid_part[:, None, :] + encp_ref[...] + ba)           # (B, S, H) f32
        # VPU multiply + lane reduce (XLU slot) instead of B tiny 1-row MXU matmuls.
        score = jnp.sum(energy * va, axis=2)                                   # (B, S) f32
        # NOTE: torch uses -inf; -1e30 keeps fully-masked (padded) rows finite.
        score = jnp.where(mask_ref[...] != 0.0, score, -1e30)
        score = score - jnp.max(score, axis=1, keepdims=True)
        es = jnp.exp(score)
        attn = es / jnp.sum(es, axis=1, keepdims=True)                         # exact softmax
        attn_ref[...] = attn
        # context vector on the MXU against the bf16 encoder outputs
        weighted = jnp.einsum("bqs,bsd->bqd", attn[:, None, :].astype(bf16),
                              enc_ref[...], preferred_element_type=f32)[:, 0, :]   # (B, 2H)

        # ---------------- 2-layer LSTM cell (one step, gate order i,f,g,o) ----------------
        # TODO(synk): at H=32 each gate slice is a 32-of-128 lane sub-slice; production
        # H >= 128 makes every gate a full lane-aligned block (clean full-vreg VPU work).
        gates0 = (jnp.dot(x0_ref[...], w0T_ref[0:EH, :], preferred_element_type=f32)
                  + jnp.dot(weighted.astype(bf16), w0T_ref[EH:EH + 2 * H, :],
                            preferred_element_type=f32)
                  + small_ref[0:1, :])
        i0 = jax.nn.sigmoid(gates0[:, 0:H])
        f0 = jax.nn.sigmoid(gates0[:, H:2 * H])
        g0 = jnp.tanh(gates0[:, 2 * H:3 * H])
        o0 = jax.nn.sigmoid(gates0[:, 3 * H:4 * H])
        c0 = f0 * c_ref[0] + i0 * g0
        h0 = o0 * jnp.tanh(c0)
        h_out_ref[0] = h0
        c_out_ref[0] = c0

        gates1 = (jnp.dot(h0.astype(bf16), w1T_ref[0:H, :], preferred_element_type=f32)
                  + jnp.dot(h_ref[1].astype(bf16), w1T_ref[H:2 * H, :],
                            preferred_element_type=f32)
                  + small_ref[1:2, :])
        i1 = jax.nn.sigmoid(gates1[:, 0:H])
        f1 = jax.nn.sigmoid(gates1[:, H:2 * H])
        g1 = jnp.tanh(gates1[:, 2 * H:3 * H])
        o1 = jax.nn.sigmoid(gates1[:, 3 * H:4 * H])
        c1 = f1 * c_ref[1] + i1 * g1
        h1 = o1 * jnp.tanh(c1)
        h_out_ref[1] = h1
        c_out_ref[1] = c1

        # pointer head: tiny f32 lane reduces (full-precision p_gen, uses the XLU slot)
        wp_o = small_ref[3:4, 0:H]
        wp_w = small_ref[3:4, H:3 * H]
        bp = small_ref[3:4, 3 * H:3 * H + 1]
        pgen_ref[...] = jax.nn.sigmoid(jnp.sum(h1 * wp_o, axis=1, keepdims=True)
                                       + jnp.sum(weighted * wp_w, axis=1, keepdims=True)
                                       + bp)

        # bf16 copies made once (no per-tile casts)
        h1_sc[...] = h1.astype(bf16)
        w_sc[...] = weighted.astype(bf16)

    # ------------ vocab head: one lane-dense tile of fc_out per grid iteration ------------
    out = (jnp.dot(h1_sc[...], woutT_ref[0:H, :], preferred_element_type=f32)
           + jnp.dot(w_sc[...], woutT_ref[H:3 * H, :], preferred_element_type=f32)
           + bout_ref[...])
    pred_ref[...] = out


# ----------------------------------- host-side glue -----------------------------------

def init_params(key, V, E, H):
    """PyTorch-layout parameters (out_features, in_features), f32."""
    ks = jax.random.split(key, 20)
    n = lambda k, shape, s=0.1: s * jax.random.normal(k, shape, dtype=jnp.float32)
    return {
        "embedding": n(ks[0], (V, E), 1.0),
        # Attention: nn.Linear(3H, H) split into hidden-part (H,H) and encoder-part (H,2H)
        "wa_h": n(ks[1], (H, H)), "wa_e": n(ks[2], (H, 2 * H)),
        "ba": n(ks[3], (1, H)), "va": jax.random.uniform(ks[4], (1, H), dtype=jnp.float32),
        # LSTM layer 0: input size E + 2H (split), b0 = b_ih + b_hh combined
        "wih0_e": n(ks[5], (4 * H, E)), "wih0_w": n(ks[6], (4 * H, 2 * H)),
        "whh0": n(ks[7], (4 * H, H)), "b0": n(ks[8], (1, 4 * H)),
        # LSTM layer 1
        "wih1": n(ks[9], (4 * H, H)), "whh1": n(ks[10], (4 * H, H)), "b1": n(ks[11], (1, 4 * H)),
        # fc_out: nn.Linear(3H, V) split
        "wfc_o": n(ks[12], (V, H)), "wfc_w": n(ks[13], (V, 2 * H)), "bfc": n(ks[14], (1, V)),
        # pointer: nn.Linear(3H, 1) split
        "wp_o": n(ks[15], (1, H)), "wp_w": n(ks[16], (1, 2 * H)), "bp": n(ks[17], (1, 1)),
    }


_BF16_KEYS = ("embedding", "wa_h", "wa_e", "wih0_e", "wih0_w", "whh0",
              "wih1", "whh1", "wfc_o", "wfc_w")


def quantize_weights(params):
    """bf16-roundtrip the matmul weights so the f32 reference and the bf16 kernel share values."""
    q = dict(params)
    for k in _BF16_KEYS:
        q[k] = params[k].astype(jnp.bfloat16).astype(jnp.float32)
    return q


def prepare_params(p):
    """One-time packing: pre-transpose, concatenate along K, pad the vocab head to a
    lane multiple, pack all tiny f32 params into one array, narrow matmul weights to bf16."""
    H = p["wa_h"].shape[0]
    V = p["bfc"].shape[1]
    Vp = ((V + 127) // 128) * 128
    bf16 = jnp.bfloat16

    w0 = jnp.concatenate([p["wih0_e"], p["whh0"], p["wih0_w"]], axis=1).T     # (E+3H, 4H)
    w1 = jnp.concatenate([p["wih1"], p["whh1"]], axis=1).T                    # (2H, 4H)
    wfc = jnp.concatenate([p["wfc_o"], p["wfc_w"]], axis=1)                   # (V, 3H)
    wout = jnp.zeros((Vp, 3 * H), jnp.float32).at[:V].set(wfc).T              # (3H, Vp)
    bout = jnp.zeros((1, Vp), jnp.float32).at[:, :V].set(p["bfc"])

    small = jnp.zeros((4, 4 * H), jnp.float32)
    small = small.at[0].set(p["b0"][0])
    small = small.at[1].set(p["b1"][0])
    small = small.at[2, 0:H].set(p["ba"][0])
    small = small.at[2, H:2 * H].set(p["va"][0])
    small = small.at[3, 0:H].set(p["wp_o"][0])
    small = small.at[3, H:3 * H].set(p["wp_w"][0])
    small = small.at[3, 3 * H].set(p["bp"][0, 0])

    prep = {
        "embedding": p["embedding"],
        "wa_eT": p["wa_e"].T,                        # f32, consumed once per sequence
        "wa_hT": p["wa_h"].T.astype(bf16),
        "w0T": w0.astype(bf16),
        "w1T": w1.astype(bf16),
        "small": small,
        "woutT": wout.astype(bf16),
        "bout": bout,
    }
    return prep, V


def precompute_encoder(prep, encoder_outputs, mask):
    """Once per sequence: Bahdanau enc projection (f32), bf16 cast of the encoder
    outputs, and batch padding to a sublane multiple (>=8 MXU rows)."""
    B = encoder_outputs.shape[0]
    Bp = max(8, -(-B // 8) * 8)
    pad = Bp - B
    enc_proj = jnp.einsum("bsd,dh->bsh", encoder_outputs, prep["wa_eT"])
    enc_bf = jnp.pad(encoder_outputs, ((0, pad), (0, 0), (0, 0))).astype(jnp.bfloat16)
    enc_proj = jnp.pad(enc_proj, ((0, pad), (0, 0), (0, 0)))
    mask_p = jnp.pad(mask, ((0, pad), (0, 0)))
    return enc_bf, enc_proj, mask_p


def _pick_vocab_tile(Vp, H, Bp, budget_bytes=8 << 20):
    """Largest lane-aligned vocab tile dividing Vp whose double-buffered head weight,
    bias and output blocks stay inside a conservative per-generation VMEM budget."""
    per_col = 2 * (3 * H * 2 + 4 + Bp * 4)   # 2x buffered: bf16 weight col + f32 bias + f32 out
    vt = min(Vp, max(128, (budget_bytes // per_col) // 128 * 128))
    while Vp % vt:
        vt -= 128
    return vt


def decoder_forward(prep, input_ids, hidden, cell, enc_bf, enc_proj, mask_p, *, V):
    """One PGN decoder step.  enc_bf / enc_proj / mask_p come from precompute_encoder
    (batch already padded, encoder outputs already bf16).  Returns
    (prediction, hidden, cell, p_gen, attention) at the original batch size."""
    L, B, H = hidden.shape
    Bp, S, _ = enc_bf.shape
    E = prep["embedding"].shape[1]
    EH = E + H
    pad = Bp - B

    # Embedding lookup (torch.no_grad gather) stays in plain-JAX glue; fused by jit.
    emb = jnp.take(prep["embedding"], input_ids, axis=0)                 # (B, E)
    x0 = jnp.concatenate([emb, hidden[0]], axis=1)                       # (B, E+H)
    x0 = jnp.pad(x0, ((0, pad), (0, 0))).astype(jnp.bfloat16)
    hidden_p = jnp.pad(hidden, ((0, 0), (0, pad), (0, 0)))
    cell_p = jnp.pad(cell, ((0, 0), (0, pad), (0, 0)))

    Vp = prep["bout"].shape[1]
    Vt = _pick_vocab_tile(Vp, H, Bp)
    grid = (Vp // Vt,)

    c2 = lambda j: (0, 0)
    c3 = lambda j: (0, 0, 0)
    in_specs = [
        pl.BlockSpec((Bp, EH), c2),               # x0
        pl.BlockSpec((L, Bp, H), c3),             # hidden
        pl.BlockSpec((L, Bp, H), c3),             # cell
        pl.BlockSpec((Bp, S, 2 * H), c3),         # encoder outputs (bf16)
        pl.BlockSpec((Bp, S, H), c3),             # encoder projection
        pl.BlockSpec((Bp, S), c2),                # mask
        pl.BlockSpec((H, H), c2),                 # wa_hT
        pl.BlockSpec((EH + 2 * H, 4 * H), c2),    # w0T
        pl.BlockSpec((2 * H, 4 * H), c2),         # w1T
        pl.BlockSpec((4, 4 * H), c2),             # packed small f32 params
        pl.BlockSpec((3 * H, Vt), lambda j: (0, j)),   # fc_out weight tile
        pl.BlockSpec((1, Vt), lambda j: (0, j)),       # fc_out bias tile
    ]
    out_specs = [
        pl.BlockSpec((Bp, Vt), lambda j: (0, j)),      # prediction tile (lane-dense store)
        pl.BlockSpec((L, Bp, H), c3),                  # hidden
        pl.BlockSpec((L, Bp, H), c3),                  # cell
        pl.BlockSpec((Bp, 1), c2),                     # p_gen
        pl.BlockSpec((Bp, S), c2),                     # attention
    ]
    out_shape = (
        jax.ShapeDtypeStruct((Bp, Vp), jnp.float32),
        jax.ShapeDtypeStruct((L, Bp, H), jnp.float32),
        jax.ShapeDtypeStruct((L, Bp, H), jnp.float32),
        jax.ShapeDtypeStruct((Bp, 1), jnp.float32),
        jax.ShapeDtypeStruct((Bp, S), jnp.float32),
    )

    pred, h_out, c_out, pgen, attn = pl.pallas_call(
        decoder_kernel,
        out_shape=out_shape,
        grid_spec=pltpu.PrefetchScalarGridSpec(
            num_scalar_prefetch=0,
            grid=grid,
            in_specs=in_specs,
            out_specs=out_specs,
            scratch_shapes=[pltpu.VMEM((Bp, H), jnp.bfloat16),
                            pltpu.VMEM((Bp, 2 * H), jnp.bfloat16)]),
        # hidden/cell written in place (no per-step HBM re-allocation of the state).
        input_output_aliases={1: 1, 2: 2},
        compiler_params=pltpu.CompilerParams(
            # Vocab axis is "arbitrary": the state is computed once at j==0 and carried
            # in scratch.  TODO(synk): split the head into its own call (or recompute the
            # state per tile) to mark this axis "parallel" for v7x megacore.
            dimension_semantics=("arbitrary",),
            vmem_limit_bytes=32 * 1024 * 1024),
    )(x0, hidden_p, cell_p, enc_bf, enc_proj, mask_p,
      prep["wa_hT"], prep["w0T"], prep["w1T"], prep["small"],
      prep["woutT"], prep["bout"])

    return (pred[:B, :V], h_out[:, :B], c_out[:, :B], pgen[:B], attn[:B])


def reference_forward(params, input_ids, hidden, cell, enc, mask):
    """Pure-JAX f32 reference mirroring the PyTorch Decoder.forward."""
    emb = jnp.take(params["embedding"], input_ids, axis=0)
    h_last = hidden[-1]
    hid_part = h_last @ params["wa_h"].T
    enc_part = jnp.einsum("bsd,hd->bsh", enc, params["wa_e"])
    energy = jnp.tanh(hid_part[:, None, :] + enc_part + params["ba"].reshape(1, 1, -1))
    score = jnp.einsum("bsh,h->bs", energy, params["va"].reshape(-1))
    score = jnp.where(mask != 0.0, score, -jnp.inf)
    attn = jax.nn.softmax(score, axis=1)
    weighted = jnp.einsum("bs,bsd->bd", attn, enc)

    H = hidden.shape[2]
    gates0 = (emb @ params["wih0_e"].T + weighted @ params["wih0_w"].T
              + hidden[0] @ params["whh0"].T + params["b0"].reshape(1, -1))
    i0, f0 = jax.nn.sigmoid(gates0[:, :H]), jax.nn.sigmoid(gates0[:, H:2 * H])
    g0, o0 = jnp.tanh(gates0[:, 2 * H:3 * H]), jax.nn.sigmoid(gates0[:, 3 * H:])
    c0 = f0 * cell[0] + i0 * g0
    h0 = o0 * jnp.tanh(c0)

    gates1 = (h0 @ params["wih1"].T + hidden[1] @ params["whh1"].T + params["b1"].reshape(1, -1))
    i1, f1 = jax.nn.sigmoid(gates1[:, :H]), jax.nn.sigmoid(gates1[:, H:2 * H])
    g1, o1 = jnp.tanh(gates1[:, 2 * H:3 * H]), jax.nn.sigmoid(gates1[:, 3 * H:])
    c1 = f1 * cell[1] + i1 * g1
    h1 = o1 * jnp.tanh(c1)

    pred = h1 @ params["wfc_o"].T + weighted @ params["wfc_w"].T + params["bfc"].reshape(1, -1)
    pg = jax.nn.sigmoid(h1 @ params["wp_o"].T + weighted @ params["wp_w"].T
                        + params["bp"].reshape(1, -1))
    new_h = jnp.stack([h0, h1], axis=0)
    new_c = jnp.stack([c0, c1], axis=0)
    return pred, new_h, new_c, pg, attn


if __name__ == "__main__":
    B, S, H, L, V, E = 2, 8, 32, 2, 128, 768

    key = jax.random.PRNGKey(0)
    kp, k1, k2, k3, k4 = jax.random.split(key, 5)

    raw = init_params(kp, V, E, H)
    qparams = quantize_weights(raw)            # bf16-representable weight values (shared)
    prep, vocab_size = prepare_params(qparams) # one-time pre-transpose / packing / bf16

    input_ids = jax.random.randint(k1, (B,), 0, V)
    hidden = jax.random.normal(k2, (L, B, H), dtype=jnp.float32)
    cell = jax.random.normal(k3, (L, B, H), dtype=jnp.float32)
    encoder_outputs = jax.random.normal(k4, (B, S, 2 * H), dtype=jnp.float32)
    lengths = jnp.array([S, 5])
    mask = (jnp.arange(S)[None, :] < lengths[:, None]).astype(jnp.float32)

    # once per sequence: enc projection, bf16 encoder cast, batch padding
    enc_bf, enc_proj, mask_p = precompute_encoder(prep, encoder_outputs, mask)

    step = jax.jit(functools.partial(decoder_forward, V=vocab_size))
    outs = step(prep, input_ids, hidden, cell, enc_bf, enc_proj, mask_p)
    outs = jax.block_until_ready(outs)

    refs = reference_forward(qparams, input_ids, hidden, cell, encoder_outputs, mask)
    names = ["prediction", "hidden", "cell", "p_gen", "attention"]
    # Tolerance reflects bf16 matmul inputs (weights + activation casts) vs the f32 reference.
    for o, r, name in zip(outs, refs, names):
        assert o.shape == r.shape, f"{name}: shape {o.shape} vs {r.shape}"
        if not jnp.allclose(o, r, rtol=3e-2, atol=3e-2):
            err = float(jnp.max(jnp.abs(o - r)))
            raise AssertionError(f"mismatch in {name}: max abs err {err:.4g}")

    print("KERNEL_OK")
</pallas_src>

<mosaic_0001>
module attributes {stable_mosaic.version = 11 : i64} {
  func.func @decoder_kernel(%arg0: i32, %arg1: memref<8x800xbf16, #tpu.memory_space<vmem>>, %arg2: memref<2x8x32xf32, #tpu.memory_space<vmem>>, %arg3: memref<2x8x32xf32, #tpu.memory_space<vmem>>, %arg4: memref<8x8x64xbf16, #tpu.memory_space<vmem>>, %arg5: memref<8x8x32xf32, #tpu.memory_space<vmem>>, %arg6: memref<8x8xf32, #tpu.memory_space<vmem>>, %arg7: memref<32x32xbf16, #tpu.memory_space<vmem>>, %arg8: memref<864x128xbf16, #tpu.memory_space<vmem>>, %arg9: memref<64x128xbf16, #tpu.memory_space<vmem>>, %arg10: memref<4x128xf32, #tpu.memory_space<vmem>>, %arg11: memref<96x128xbf16, #tpu.memory_space<vmem>>, %arg12: memref<1x128xf32, #tpu.memory_space<vmem>>, %arg13: memref<8x128xf32, #tpu.memory_space<vmem>>, %arg14: memref<2x8x32xf32, #tpu.memory_space<vmem>>, %arg15: memref<2x8x32xf32, #tpu.memory_space<vmem>>, %arg16: memref<8x1xf32, #tpu.memory_space<vmem>>, %arg17: memref<8x8xf32, #tpu.memory_space<vmem>>, %arg18: memref<8x32xbf16, #tpu.memory_space<vmem>>, %arg19: memref<8x64xbf16, #tpu.memory_space<vmem>>) attributes {dimension_semantics = [#tpu.dimension_semantics<arbitrary>], iteration_bounds = array<i64: 1>, scalar_prefetch = 0 : i64, scratch_operands = 2 : i64, tpu.core_type = #tpu.core_type<tc>, window_params = [{pipeline_mode = #tpu.pipeline_mode<synchronous>, transform_indices = @transform_0, window_bounds = array<i64: 8, 800>}, {pipeline_mode = #tpu.pipeline_mode<synchronous>, transform_indices = @transform_1, window_bounds = array<i64: 2, 8, 32>}, {pipeline_mode = #tpu.pipeline_mode<synchronous>, transform_indices = @transform_2, window_bounds = array<i64: 2, 8, 32>}, {pipeline_mode = #tpu.pipeline_mode<synchronous>, transform_indices = @transform_3, window_bounds = array<i64: 8, 8, 64>}, {pipeline_mode = #tpu.pipeline_mode<synchronous>, transform_indices = @transform_4, window_bounds = array<i64: 8, 8, 32>}, {pipeline_mode = #tpu.pipeline_mode<synchronous>, transform_indices = @transform_5, window_bounds = array<i64: 8, 8>}, {pipeline_mode = #tpu.pipeline_mode<synchronous>, transform_indices = @transform_6, window_bounds = array<i64: 32, 32>}, {pipeline_mode = #tpu.pipeline_mode<synchronous>, transform_indices = @transform_7, window_bounds = array<i64: 864, 128>}, {pipeline_mode = #tpu.pipeline_mode<synchronous>, transform_indices = @transform_8, window_bounds = array<i64: 64, 128>}, {pipeline_mode = #tpu.pipeline_mode<synchronous>, transform_indices = @transform_9, window_bounds = array<i64: 4, 128>}, {transform_indices = @transform_10, window_bounds = array<i64: 96, 128>}, {transform_indices = @transform_11, window_bounds = array<i64: 1, 128>}, {transform_indices = @transform_12, window_bounds = array<i64: 8, 128>}, {pipeline_mode = #tpu.pipeline_mode<synchronous>, transform_indices = @transform_13, window_bounds = array<i64: 2, 8, 32>}, {pipeline_mode = #tpu.pipeline_mode<synchronous>, transform_indices = @transform_14, window_bounds = array<i64: 2, 8, 32>}, {pipeline_mode = #tpu.pipeline_mode<synchronous>, transform_indices = @transform_15, window_bounds = array<i64: 8, 1>}, {pipeline_mode = #tpu.pipeline_mode<synchronous>, transform_indices = @transform_16, window_bounds = array<i64: 8, 8>}]} {
    %c0_i32 = arith.constant 0 : i32
    %0 = arith.cmpi eq, %arg0, %c0_i32 : i32
    %1 = arith.extui %0 : i1 to i32
    %c0_i32_0 = arith.constant 0 : i32
    %2 = arith.cmpi ne, %1, %c0_i32_0 : i32
    scf.if %2 {
      %c1 = arith.constant 1 : index
      %c0_12 = arith.constant 0 : index
      %c0_13 = arith.constant 0 : index
      %14 = vector.load %arg2[%c1, %c0_12, %c0_13] : memref<2x8x32xf32, #tpu.memory_space<vmem>>, vector<1x8x32xf32>
      %15 = vector.shape_cast %14 : vector<1x8x32xf32> to vector<8x32xf32>
      %16 = arith.truncf %15 : vector<8x32xf32> to vector<8x32xbf16>
      %c0_14 = arith.constant 0 : index
      %c0_15 = arith.constant 0 : index
      %17 = vector.load %arg7[%c0_14, %c0_15] : memref<32x32xbf16, #tpu.memory_space<vmem>>, vector<32x32xbf16>
      %cst_16 = arith.constant dense<0.000000e+00> : vector<8x32xf32>
      %18 = tpu.matmul %16, %17, %cst_16 {dimension_numbers = #tpu.dot_dimension_numbers<[1], [0], [0], [1], [0, 0, 1, 1], [], []>} : vector<8x32xbf16>, vector<32x32xbf16>, vector<8x32xf32> -> vector<8x32xf32>
      %c2 = arith.constant 2 : index
      %c0_17 = arith.constant 0 : index
      %19 = vector.load %arg10[%c2, %c0_17] : memref<4x128xf32, #tpu.memory_space<vmem>>, vector<1x32xf32>
      %20 = vector.shape_cast %19 : vector<1x32xf32> to vector<1x1x32xf32>
      %c2_18 = arith.constant 2 : index
      %c32_19 = arith.constant 32 : index
      %21 = vector.load %arg10[%c2_18, %c32_19] : memref<4x128xf32, #tpu.memory_space<vmem>>, vector<1x32xf32>
      %22 = vector.shape_cast %21 : vector<1x32xf32> to vector<1x1x32xf32>
      %23 = vector.shape_cast %18 : vector<8x32xf32> to vector<8x1x32xf32>
      %c0_20 = arith.constant 0 : index
      %c0_21 = arith.constant 0 : index
      %c0_22 = arith.constant 0 : index
      %24 = vector.load %arg5[%c0_20, %c0_21, %c0_22] : memref<8x8x32xf32, #tpu.memory_space<vmem>>, vector<8x8x32xf32>
      %25 = vector.broadcast %23 : vector<8x1x32xf32> to vector<8x8x32xf32>
      %26 = arith.addf %25, %24 : vector<8x8x32xf32>
      %27 = vector.broadcast %20 : vector<1x1x32xf32> to vector<8x8x32xf32>
      %28 = arith.addf %26, %27 : vector<8x8x32xf32>
      %29 = math.tanh %28 : vector<8x8x32xf32>
      %30 = vector.broadcast %22 : vector<1x1x32xf32> to vector<8x8x32xf32>
      %31 = arith.mulf %29, %30 : vector<8x8x32xf32>
      %cst_23 = arith.constant dense<0.000000e+00> : vector<8x8xf32>
      %32 = vector.multi_reduction <add>, %31, %cst_23 [2] : vector<8x8x32xf32> to vector<8x8xf32>
      %c0_24 = arith.constant 0 : index
      %c0_25 = arith.constant 0 : index
      %33 = vector.load %arg6[%c0_24, %c0_25] : memref<8x8xf32, #tpu.memory_space<vmem>>, vector<8x8xf32>
      %cst_26 = arith.constant 0.000000e+00 : f32
      %34 = vector.broadcast %cst_26 : f32 to vector<8x8xf32>
      %35 = arith.cmpf one, %33, %34 : vector<8x8xf32>
      %cst_27 = arith.constant -1.000000e+30 : f32
      %36 = vector.broadcast %cst_27 : f32 to vector<8x8xf32>
      %37 = arith.select %35, %32, %36 : vector<8x8xi1>, vector<8x8xf32>
      %cst_28 = arith.constant dense<0xFF800000> : vector<8xf32>
      %38 = vector.multi_reduction <maximumf>, %37, %cst_28 [1] : vector<8x8xf32> to vector<8xf32>
      %39 = vector.shape_cast %38 : vector<8xf32> to vector<8x1xf32>
      %40 = vector.broadcast %39 : vector<8x1xf32> to vector<8x8xf32>
      %41 = arith.subf %37, %40 : vector<8x8xf32>
      %42 = math.exp %41 : vector<8x8xf32>
      %cst_29 = arith.constant dense<0.000000e+00> : vector<8xf32>
      %43 = vector.multi_reduction <add>, %42, %cst_29 [1] : vector<8x8xf32> to vector<8xf32>
      %44 = vector.shape_cast %43 : vector<8xf32> to vector<8x1xf32>
      %45 = vector.broadcast %44 : vector<8x1xf32> to vector<8x8xf32>
      %46 = arith.divf %42, %45 : vector<8x8xf32>
      %c0_30 = arith.constant 0 : index
      %c0_31 = arith.constant 0 : index
      %47 = vector.load %arg17[%c0_30, %c0_31] : memref<8x8xf32, #tpu.memory_space<vmem>>, vector<8x8xf32>
      tpu.vector_store %arg17[%c0_30, %c0_31], %46 {strides = array<i32>} : memref<8x8xf32, #tpu.memory_space<vmem>>, vector<8x8xf32>,
      %48 = vector.shape_cast %46 : vector<8x8xf32> to vector<8x1x8xf32>
      %49 = arith.truncf %48 : vector<8x1x8xf32> to vector<8x1x8xbf16>
      %c0_32 = arith.constant 0 : index
      %c0_33 = arith.constant 0 : index
      %c0_34 = arith.constant 0 : index
      %50 = vector.load %arg4[%c0_32, %c0_33, %c0_34] : memref<8x8x64xbf16, #tpu.memory_space<vmem>>, vector<8x8x64xbf16>
      "tpu.trace_start"() <{level = 10 : i32, message = "bqs,bsd->bqd"}> : () -> ()
      %cst_35 = arith.constant dense<0.000000e+00> : vector<8x1x64xf32>
      %51 = tpu.matmul %49, %50, %cst_35 {dimension_numbers = #tpu.dot_dimension_numbers<[2], [1], [1], [2], [0, 0, 0, 1, 1, 2], [0], [0]>} : vector<8x1x8xbf16>, vector<8x8x64xbf16>, vector<8x1x64xf32> -> vector<8x1x64xf32>
      "tpu.trace_stop"() : () -> ()
      %52 = vector.shape_cast %51 : vector<8x1x64xf32> to vector<8x64xf32>
      %c0_36 = arith.constant 0 : index
      %c0_37 = arith.constant 0 : index
      %53 = vector.load %arg1[%c0_36, %c0_37] : memref<8x800xbf16, #tpu.memory_space<vmem>>, vector<8x800xbf16>
      %c0_38 = arith.constant 0 : index
      %c0_39 = arith.constant 0 : index
      %54 = vector.load %arg8[%c0_38, %c0_39] : memref<864x128xbf16, #tpu.memory_space<vmem>>, vector<800x128xbf16>
      %cst_40 = arith.constant dense<0.000000e+00> : vector<8x128xf32>
      %55 = tpu.matmul %53, %54, %cst_40 {dimension_numbers = #tpu.dot_dimension_numbers<[1], [0], [0], [1], [0, 0, 1, 1], [], []>} : vector<8x800xbf16>, vector<800x128xbf16>, vector<8x128xf32> -> vector<8x128xf32>
      %56 = arith.truncf %52 : vector<8x64xf32> to vector<8x64xbf16>
      %c800 = arith.constant 800 : index
      %c0_41 = arith.constant 0 : index
      %57 = vector.load %arg8[%c800, %c0_41] : memref<864x128xbf16, #tpu.memory_space<vmem>>, vector<64x128xbf16>
      %cst_42 = arith.constant dense<0.000000e+00> : vector<8x128xf32>
      %58 = tpu.matmul %56, %57, %cst_42 {dimension_numbers = #tpu.dot_dimension_numbers<[1], [0], [0], [1], [0, 0, 1, 1], [], []>} : vector<8x64xbf16>, vector<64x128xbf16>, vector<8x128xf32> -> vector<8x128xf32>
      %59 = arith.addf %55, %58 : vector<8x128xf32>
      %c0_43 = arith.constant 0 : index
      %c0_44 = arith.constant 0 : index
      %60 = vector.load %arg10[%c0_43, %c0_44] : memref<4x128xf32, #tpu.memory_space<vmem>>, vector<1x128xf32>
      %61 = vector.broadcast %60 : vector<1x128xf32> to vector<8x128xf32>
      %62 = arith.addf %59, %61 : vector<8x128xf32>
      %63 = vector.extract_strided_slice %62 {offsets = [0, 0], sizes = [8, 32], strides = [1, 1]} : vector<8x128xf32> to vector<8x32xf32>
      %64 = arith.negf %63 : vector<8x32xf32>
      %65 = math.exp %64 : vector<8x32xf32>
      %cst_45 = arith.constant 1.000000e+00 : f32
      %66 = vector.broadcast %cst_45 : f32 to vector<8x32xf32>
      %67 = arith.addf %66, %65 : vector<8x32xf32>
      %68 = arith.divf %66, %67 : vector<8x32xf32>
      %69 = vector.extract_strided_slice %62 {offsets = [0, 32], sizes = [8, 32], strides = [1, 1]} : vector<8x128xf32> to vector<8x32xf32>
      %70 = arith.negf %69 : vector<8x32xf32>
      %71 = math.exp %70 : vector<8x32xf32>
      %cst_46 = arith.constant 1.000000e+00 : f32
      %72 = vector.broadcast %cst_46 : f32 to vector<8x32xf32>
      %73 = arith.addf %72, %71 : vector<8x32xf32>
      %74 = arith.divf %72, %73 : vector<8x32xf32>
      %75 = vector.extract_strided_slice %62 {offsets = [0, 64], sizes = [8, 32], strides = [1, 1]} : vector<8x128xf32> to vector<8x32xf32>
      %76 = math.tanh %75 : vector<8x32xf32>
      %77 = vector.extract_strided_slice %62 {offsets = [0, 96], sizes = [8, 32], strides = [1, 1]} : vector<8x128xf32> to vector<8x32xf32>
      %78 = arith.negf %77 : vector<8x32xf32>
      %79 = math.exp %78 : vector<8x32xf32>
      %cst_47 = arith.constant 1.000000e+00 : f32
      %80 = vector.broadcast %cst_47 : f32 to vector<8x32xf32>
      %81 = arith.addf %80, %79 : vector<8x32xf32>
      %82 = arith.divf %80, %81 : vector<8x32xf32>
      %c0_48 = arith.constant 0 : index
      %c0_49 = arith.constant 0 : index
      %c0_50 = arith.constant 0 : index
      %83 = vector.load %arg3[%c0_48, %c0_49, %c0_50] : memref<2x8x32xf32, #tpu.memory_space<vmem>>, vector<1x8x32xf32>
      %84 = vector.shape_cast %83 : vector<1x8x32xf32> to vector<8x32xf32>
      %85 = arith.mulf %74, %84 : vector<8x32xf32>
      %86 = arith.mulf %68, %76 : vector<8x32xf32>
      %87 = arith.addf %85, %86 : vector<8x32xf32>
      %88 = math.tanh %87 : vector<8x32xf32>
      %89 = arith.mulf %82, %88 : vector<8x32xf32>
      %c0_51 = arith.constant 0 : index
      %c0_52 = arith.constant 0 : index
      %c0_53 = arith.constant 0 : index
      %90 = vector.load %arg14[%c0_51, %c0_52, %c0_53] : memref<2x8x32xf32, #tpu.memory_space<vmem>>, vector<1x8x32xf32>
      %91 = vector.shape_cast %90 : vector<1x8x32xf32> to vector<8x32xf32>
      %92 = vector.shape_cast %89 : vector<8x32xf32> to vector<1x8x32xf32>
      tpu.vector_store %arg14[%c0_51, %c0_52, %c0_53], %92 {strides = array<i32>} : memref<2x8x32xf32, #tpu.memory_space<vmem>>, vector<1x8x32xf32>,
      %c0_54 = arith.constant 0 : index
      %c0_55 = arith.constant 0 : index
      %c0_56 = arith.constant 0 : index
      %93 = vector.load %arg15[%c0_54, %c0_55, %c0_56] : memref<2x8x32xf32, #tpu.memory_space<vmem>>, vector<1x8x32xf32>
      %94 = vector.shape_cast %93 : vector<1x8x32xf32> to vector<8x32xf32>
      %95 = vector.shape_cast %87 : vector<8x32xf32> to vector<1x8x32xf32>
      tpu.vector_store %arg15[%c0_54, %c0_55, %c0_56], %95 {strides = array<i32>} : memref<2x8x32xf32, #tpu.memory_space<vmem>>, vector<1x8x32xf32>,
      %96 = arith.truncf %89 : vector<8x32xf32> to vector<8x32xbf16>
      %c0_57 = arith.constant 0 : index
      %c0_58 = arith.constant 0 : index
      %97 = vector.load %arg9[%c0_57, %c0_58] : memref<64x128xbf16, #tpu.memory_space<vmem>>, vector<32x128xbf16>
      %cst_59 = arith.constant dense<0.000000e+00> : vector<8x128xf32>
      %98 = tpu.matmul %96, %97, %cst_59 {dimension_numbers = #tpu.dot_dimension_numbers<[1], [0], [0], [1], [0, 0, 1, 1], [], []>} : vector<8x32xbf16>, vector<32x128xbf16>, vector<8x128xf32> -> vector<8x128xf32>
      %c1_60 = arith.constant 1 : index
      %c0_61 = arith.constant 0 : index
      %c0_62 = arith.constant 0 : index
      %99 = vector.load %arg2[%c1_60, %c0_61, %c0_62] : memref<2x8x32xf32, #tpu.memory_space<vmem>>, vector<1x8x32xf32>
      %100 = vector.shape_cast %99 : vector<1x8x32xf32> to vector<8x32xf32>
      %101 = arith.truncf %100 : vector<8x32xf32> to vector<8x32xbf16>
      %c32_63 = arith.constant 32 : index
      %c0_64 = arith.constant 0 : index
      %102 = vector.load %arg9[%c32_63, %c0_64] : memref<64x128xbf16, #tpu.memory_space<vmem>>, vector<32x128xbf16>
      %cst_65 = arith.constant dense<0.000000e+00> : vector<8x128xf32>
      %103 = tpu.matmul %101, %102, %cst_65 {dimension_numbers = #tpu.dot_dimension_numbers<[1], [0], [0], [1], [0, 0, 1, 1], [], []>} : vector<8x32xbf16>, vector<32x128xbf16>, vector<8x128xf32> -> vector<8x128xf32>
      %104 = arith.addf %98, %103 : vector<8x128xf32>
      %c1_66 = arith.constant 1 : index
      %c0_67 = arith.constant 0 : index
      %105 = vector.load %arg10[%c1_66, %c0_67] : memref<4x128xf32, #tpu.memory_space<vmem>>, vector<1x128xf32>
      %106 = vector.broadcast %105 : vector<1x128xf32> to vector<8x128xf32>
      %107 = arith.addf %104, %106 : vector<8x128xf32>
      %108 = vector.extract_strided_slice %107 {offsets = [0, 0], sizes = [8, 32], strides = [1, 1]} : vector<8x128xf32> to vector<8x32xf32>
      %109 = arith.negf %108 : vector<8x32xf32>
      %110 = math.exp %109 : vector<8x32xf32>
      %cst_68 = arith.constant 1.000000e+00 : f32
      %111 = vector.broadcast %cst_68 : f32 to vector<8x32xf32>
      %112 = arith.addf %111, %110 : vector<8x32xf32>
      %113 = arith.divf %111, %112 : vector<8x32xf32>
      %114 = vector.extract_strided_slice %107 {offsets = [0, 32], sizes = [8, 32], strides = [1, 1]} : vector<8x128xf32> to vector<8x32xf32>
      %115 = arith.negf %114 : vector<8x32xf32>
      %116 = math.exp %115 : vector<8x32xf32>
      %cst_69 = arith.constant 1.000000e+00 : f32
      %117 = vector.broadcast %cst_69 : f32 to vector<8x32xf32>
      %118 = arith.addf %117, %116 : vector<8x32xf32>
      %119 = arith.divf %117, %118 : vector<8x32xf32>
      %120 = vector.extract_strided_slice %107 {offsets = [0, 64], sizes = [8, 32], strides = [1, 1]} : vector<8x128xf32> to vector<8x32xf32>
      %121 = math.tanh %120 : vector<8x32xf32>
      %122 = vector.extract_strided_slice %107 {offsets = [0, 96], sizes = [8, 32], strides = [1, 1]} : vector<8x128xf32> to vector<8x32xf32>
      %123 = arith.negf %122 : vector<8x32xf32>
      %124 = math.exp %123 : vector<8x32xf32>
      %cst_70 = arith.constant 1.000000e+00 : f32
      %125 = vector.broadcast %cst_70 : f32 to vector<8x32xf32>
      %126 = arith.addf %125, %124 : vector<8x32xf32>
      %127 = arith.divf %125, %126 : vector<8x32xf32>
      %c1_71 = arith.constant 1 : index
      %c0_72 = arith.constant 0 : index
      %c0_73 = arith.constant 0 : index
      %128 = vector.load %arg3[%c1_71, %c0_72, %c0_73] : memref<2x8x32xf32, #tpu.memory_space<vmem>>, vector<1x8x32xf32>
      %129 = vector.shape_cast %128 : vector<1x8x32xf32> to vector<8x32xf32>
      %130 = arith.mulf %119, %129 : vector<8x32xf32>
      %131 = arith.mulf %113, %121 : vector<8x32xf32>
      %132 = arith.addf %130, %131 : vector<8x32xf32>
      %133 = math.tanh %132 : vector<8x32xf32>
      %134 = arith.mulf %127, %133 : vector<8x32xf32>
      %c1_74 = arith.constant 1 : index
      %c0_75 = arith.constant 0 : index
      %c0_76 = arith.constant 0 : index
      %135 = vector.load %arg14[%c1_74, %c0_75, %c0_76] : memref<2x8x32xf32, #tpu.memory_space<vmem>>, vector<1x8x32xf32>
      %136 = vector.shape_cast %135 : vector<1x8x32xf32> to vector<8x32xf32>
      %137 = vector.shape_cast %134 : vector<8x32xf32> to vector<1x8x32xf32>
      tpu.vector_store %arg14[%c1_74, %c0_75, %c0_76], %137 {strides = array<i32>} : memref<2x8x32xf32, #tpu.memory_space<vmem>>, vector<1x8x32xf32>,
      %c1_77 = arith.constant 1 : index
      %c0_78 = arith.constant 0 : index
      %c0_79 = arith.constant 0 : index
      %138 = vector.load %arg15[%c1_77, %c0_78, %c0_79] : memref<2x8x32xf32, #tpu.memory_space<vmem>>, vector<1x8x32xf32>
      %139 = vector.shape_cast %138 : vector<1x8x32xf32> to vector<8x32xf32>
      %140 = vector.shape_cast %132 : vector<8x32xf32> to vector<1x8x32xf32>
      tpu.vector_store %arg15[%c1_77, %c0_78, %c0_79], %140 {strides = array<i32>} : memref<2x8x32xf32, #tpu.memory_space<vmem>>, vector<1x8x32xf32>,
      %c3 = arith.constant 3 : index
      %c0_80 = arith.constant 0 : index
      %141 = vector.load %arg10[%c3, %c0_80] : memref<4x128xf32, #tpu.memory_space<vmem>>, vector<1x32xf32>
      %c3_81 = arith.constant 3 : index
      %c32_82 = arith.constant 32 : index
      %142 = vector.load %arg10[%c3_81, %c32_82] : memref<4x128xf32, #tpu.memory_space<vmem>>, vector<1x64xf32>
      %c3_83 = arith.constant 3 : index
      %c96 = arith.constant 96 : index
      %143 = vector.load %arg10[%c3_83, %c96] : memref<4x128xf32, #tpu.memory_space<vmem>>, vector<1x1xf32>
      %144 = vector.broadcast %141 : vector<1x32xf32> to vector<8x32xf32>
      %145 = arith.mulf %134, %144 : vector<8x32xf32>
      %cst_84 = arith.constant dense<0.000000e+00> : vector<8xf32>
      %146 = vector.multi_reduction <add>, %145, %cst_84 [1] : vector<8x32xf32> to vector<8xf32>
      %147 = vector.shape_cast %146 : vector<8xf32> to vector<8x1xf32>
      %148 = vector.broadcast %142 : vector<1x64xf32> to vector<8x64xf32>
      %149 = arith.mulf %52, %148 : vector<8x64xf32>
      %cst_85 = arith.constant dense<0.000000e+00> : vector<8xf32>
      %150 = vector.multi_reduction <add>, %149, %cst_85 [1] : vector<8x64xf32> to vector<8xf32>
      %151 = vector.shape_cast %150 : vector<8xf32> to vector<8x1xf32>
      %152 = arith.addf %147, %151 : vector<8x1xf32>
      %153 = vector.broadcast %143 : vector<1x1xf32> to vector<8x1xf32>
      %154 = arith.addf %152, %153 : vector<8x1xf32>
      %155 = arith.negf %154 : vector<8x1xf32>
      %156 = math.exp %155 : vector<8x1xf32>
      %cst_86 = arith.constant 1.000000e+00 : f32
      %157 = vector.broadcast %cst_86 : f32 to vector<8x1xf32>
      %158 = arith.addf %157, %156 : vector<8x1xf32>
      %159 = arith.divf %157, %158 : vector<8x1xf32>
      %c0_87 = arith.constant 0 : index
      %c0_88 = arith.constant 0 : index
      %160 = vector.load %arg16[%c0_87, %c0_88] : memref<8x1xf32, #tpu.memory_space<vmem>>, vector<8x1xf32>
      tpu.vector_store %arg16[%c0_87, %c0_88], %159 {strides = array<i32>} : memref<8x1xf32, #tpu.memory_space<vmem>>, vector<8x1xf32>,
      %161 = arith.truncf %134 : vector<8x32xf32> to vector<8x32xbf16>
      %c0_89 = arith.constant 0 : index
      %c0_90 = arith.constant 0 : index
      %162 = vector.load %arg18[%c0_89, %c0_90] : memref<8x32xbf16, #tpu.memory_space<vmem>>, vector<8x32xbf16>
      tpu.vector_store %arg18[%c0_89, %c0_90], %161 {strides = array<i32>} : memref<8x32xbf16, #tpu.memory_space<vmem>>, vector<8x32xbf16>,
      %163 = arith.truncf %52 : vector<8x64xf32> to vector<8x64xbf16>
      %c0_91 = arith.constant 0 : index
      %c0_92 = arith.constant 0 : index
      %164 = vector.load %arg19[%c0_91, %c0_92] : memref<8x64xbf16, #tpu.memory_space<vmem>>, vector<8x64xbf16>
      tpu.vector_store %arg19[%c0_91, %c0_92], %163 {strides = array<i32>} : memref<8x64xbf16, #tpu.memory_space<vmem>>, vector<8x64xbf16>,
    } else {
    }
    %c0 = arith.constant 0 : index
    %c0_1 = arith.constant 0 : index
    %3 = vector.load %arg18[%c0, %c0_1] : memref<8x32xbf16, #tpu.memory_space<vmem>>, vector<8x32xbf16>
    %c0_2 = arith.constant 0 : index
    %c0_3 = arith.constant 0 : index
    %4 = vector.load %arg11[%c0_2, %c0_3] : memref<96x128xbf16, #tpu.memory_space<vmem>>, vector<32x128xbf16>
    %cst = arith.constant dense<0.000000e+00> : vector<8x128xf32>
    %5 = tpu.matmul %3, %4, %cst {dimension_numbers = #tpu.dot_dimension_numbers<[1], [0], [0], [1], [0, 0, 1, 1], [], []>} : vector<8x32xbf16>, vector<32x128xbf16>, vector<8x128xf32> -> vector<8x128xf32>
    %c0_4 = arith.constant 0 : index
    %c0_5 = arith.constant 0 : index
    %6 = vector.load %arg19[%c0_4, %c0_5] : memref<8x64xbf16, #tpu.memory_space<vmem>>, vector<8x64xbf16>
    %c32 = arith.constant 32 : index
    %c0_6 = arith.constant 0 : index
    %7 = vector.load %arg11[%c32, %c0_6] : memref<96x128xbf16, #tpu.memory_space<vmem>>, vector<64x128xbf16>
    %cst_7 = arith.constant dense<0.000000e+00> : vector<8x128xf32>
    %8 = tpu.matmul %6, %7, %cst_7 {dimension_numbers = #tpu.dot_dimension_numbers<[1], [0], [0], [1], [0, 0, 1, 1], [], []>} : vector<8x64xbf16>, vector<64x128xbf16>, vector<8x128xf32> -> vector<8x128xf32>
    %9 = arith.addf %5, %8 : vector<8x128xf32>
    %c0_8 = arith.constant 0 : index
    %c0_9 = arith.constant 0 : index
    %10 = vector.load %arg12[%c0_8, %c0_9] : memref<1x128xf32, #tpu.memory_space<vmem>>, vector<1x128xf32>
    %11 = vector.broadcast %10 : vector<1x128xf32> to vector<8x128xf32>
    %12 = arith.addf %9, %11 : vector<8x128xf32>
    %c0_10 = arith.constant 0 : index
    %c0_11 = arith.constant 0 : index
    %13 = vector.load %arg13[%c0_10, %c0_11] : memref<8x128xf32, #tpu.memory_space<vmem>>, vector<8x128xf32>
    tpu.vector_store %arg13[%c0_10, %c0_11], %12 {strides = array<i32>} : memref<8x128xf32, #tpu.memory_space<vmem>>, vector<8x128xf32>,
    return
  }
  func.func @transform_0(%arg0: i32) -> (i32, i32) {
    %c0_i32 = arith.constant 0 : i32
    %c0_i32_0 = arith.constant 0 : i32
    %c0_i32_1 = arith.constant 0 : i32
    return %c0_i32, %c0_i32_0 : i32, i32
  }
  func.func @transform_1(%arg0: i32) -> (i32, i32, i32) {
    %c0_i32 = arith.constant 0 : i32
    %c0_i32_0 = arith.constant 0 : i32
    %c0_i32_1 = arith.constant 0 : i32
    %c0_i32_2 = arith.constant 0 : i32
    return %c0_i32, %c0_i32_0, %c0_i32_1 : i32, i32, i32
  }
  func.func @transform_2(%arg0: i32) -> (i32, i32, i32) {
    %c0_i32 = arith.constant 0 : i32
    %c0_i32_0 = arith.constant 0 : i32
    %c0_i32_1 = arith.constant 0 : i32
    %c0_i32_2 = arith.constant 0 : i32
    return %c0_i32, %c0_i32_0, %c0_i32_1 : i32, i32, i32
  }
  func.func @transform_3(%arg0: i32) -> (i32, i32, i32) {
    %c0_i32 = arith.constant 0 : i32
    %c0_i32_0 = arith.constant 0 : i32
    %c0_i32_1 = arith.constant 0 : i32
    %c0_i32_2 = arith.constant 0 : i32
    return %c0_i32, %c0_i32_0, %c0_i32_1 : i32, i32, i32
  }
  func.func @transform_4(%arg0: i32) -> (i32, i32, i32) {
    %c0_i32 = arith.constant 0 : i32
    %c0_i32_0 = arith.constant 0 : i32
    %c0_i32_1 = arith.constant 0 : i32
    %c0_i32_2 = arith.constant 0 : i32
    return %c0_i32, %c0_i32_0, %c0_i32_1 : i32, i32, i32
  }
  func.func @transform_5(%arg0: i32) -> (i32, i32) {
    %c0_i32 = arith.constant 0 : i32
    %c0_i32_0 = arith.constant 0 : i32
    %c0_i32_1 = arith.constant 0 : i32
    return %c0_i32, %c0_i32_0 : i32, i32
  }
  func.func @transform_6(%arg0: i32) -> (i32, i32) {
    %c0_i32 = arith.constant 0 : i32
    %c0_i32_0 = arith.constant 0 : i32
    %c0_i32_1 = arith.constant 0 : i32
    return %c0_i32, %c0_i32_0 : i32, i32
  }
  func.func @transform_7(%arg0: i32) -> (i32, i32) {
    %c0_i32 = arith.constant 0 : i32
    %c0_i32_0 = arith.constant 0 : i32
    %c0_i32_1 = arith.constant 0 : i32
    return %c0_i32, %c0_i32_0 : i32, i32
  }
  func.func @transform_8(%arg0: i32) -> (i32, i32) {
    %c0_i32 = arith.constant 0 : i32
    %c0_i32_0 = arith.constant 0 : i32
    %c0_i32_1 = arith.constant 0 : i32
    return %c0_i32, %c0_i32_0 : i32, i32
  }
  func.func @transform_9(%arg0: i32) -> (i32, i32) {
    %c0_i32 = arith.constant 0 : i32
    %c0_i32_0 = arith.constant 0 : i32
    %c0_i32_1 = arith.constant 0 : i32
    return %c0_i32, %c0_i32_0 : i32, i32
  }
  func.func @transform_10(%arg0: i32) -> (i32, i32) {
    %c0_i32 = arith.constant 0 : i32
    %c0_i32_0 = arith.constant 0 : i32
    return %c0_i32, %arg0 : i32, i32
  }
  func.func @transform_11(%arg0: i32) -> (i32, i32) {
    %c0_i32 = arith.constant 0 : i32
    %c0_i32_0 = arith.constant 0 : i32
    return %c0_i32, %arg0 : i32, i32
  }
  func.func @transform_12(%arg0: i32) -> (i32, i32) {
    %c0_i32 = arith.constant 0 : i32
    %c0_i32_0 = arith.constant 0 : i32
    return %c0_i32, %arg0 : i32, i32
  }
  func.func @transform_13(%arg0: i32) -> (i32, i32, i32) {
    %c0_i32 = arith.constant 0 : i32
    %c0_i32_0 = arith.constant 0 : i32
    %c0_i32_1 = arith.constant 0 : i32
    %c0_i32_2 = arith.constant 0 : i32
    return %c0_i32, %c0_i32_0, %c0_i32_1 : i32, i32, i32
  }
  func.func @transform_14(%arg0: i32) -> (i32, i32, i32) {
    %c0_i32 = arith.constant 0 : i32
    %c0_i32_0 = arith.constant 0 : i32
    %c0_i32_1 = arith.constant 0 : i32
    %c0_i32_2 = arith.constant 0 : i32
    return %c0_i32, %c0_i32_0, %c0_i32_1 : i32, i32, i32
  }
  func.func @transform_15(%arg0: i32) -> (i32, i32) {
    %c0_i32 = arith.constant 0 : i32
    %c0_i32_0 = arith.constant 0 : i32
    %c0_i32_1 = arith.constant 0 : i32
    return %c0_i32, %c0_i32_0 : i32, i32
  }
  func.func @transform_16(%arg0: i32) -> (i32, i32) {
    %c0_i32 = arith.constant 0 : i32
    %c0_i32_0 = arith.constant 0 : i32
    %c0_i32_1 = arith.constant 0 : i32
    return %c0_i32, %c0_i32_0 : i32, i32
  }
}

</mosaic_0001>

<bundles_post_ra>
// kernel: decoder_forward.1
= control target key start
LH: loop header
LB: loop body
LE: loop exit
PB: predicated region body
PF: predicated region fallthrough
CT: control target
= control target key end

     0   :  { %s3104_s0 = inlined_call_operand.vmem [shape: bf16[8,800], index: 0, kind: input, shape index: {}]   ;;  %s3105_s1 = inlined_call_operand.vmem [shape: f32[2,8,32], index: 1, kind: input, shape index: {}, may-alias: {1,13}]   ;;  %s3106_s2 = inlined_call_operand.vmem [shape: f32[2,8,32], index: 2, kind: input, shape index: {}, may-alias: {2,14}]   ;;  %s3107_s3 = inlined_call_operand.vmem [shape: bf16[8,8,64], index: 3, kind: input, shape index: {}]   ;;  %s3108_s4 = inlined_call_operand.vmem [shape: f32[8,8,32], index: 4, kind: input, shape index: {}]   ;;  %s3109_s5 = inlined_call_operand.vmem [shape: f32[8,8], index: 5, kind: input, shape index: {}]   ;;  %s3110_s6 = inlined_call_operand.hbm [shape: bf16[32,32], index: 6, kind: input, shape index: {}]   ;;  %s3111_s7 = inlined_call_operand.hbm [shape: bf16[864,128], index: 7, kind: input, shape index: {}]   ;;  %s3112_s8 = inlined_call_operand.vmem [shape: bf16[64,128], index: 8, kind: input, shape index: {}]   ;;  %s3113_s9 = inlined_call_operand.hbm [shape: f32[4,128], index: 9, kind: input, shape index: {}]   ;;  %s3114_s10 = inlined_call_operand.vmem [shape: bf16[96,128], index: 10, kind: input, shape index: {}]   ;;  %s3115_s11 = inlined_call_operand.hbm [shape: f32[1,128], index: 11, kind: input, shape index: {}]   ;;  %s3116_s12 = inlined_call_operand.vmem [shape: f32[8,128], index: 12, kind: output, shape index: {0}]   ;;  %s3117_s13 = inlined_call_operand.vmem [shape: f32[2,8,32], index: 13, kind: output, shape index: {1}, may-alias: {1,13}]   ;;  %s3118_s14 = inlined_call_operand.vmem [shape: f32[2,8,32], index: 14, kind: output, shape index: {2}, may-alias: {2,14}]   ;;  %s3119_s15 = inlined_call_operand.vmem [shape: f32[8,1], index: 15, kind: output, shape index: {3}]   ;;  %s3120_s16 = inlined_call_operand.vmem [shape: f32[8,8], index: 16, kind: output, shape index: {4}]  }
   0x1   :  { %3122 = sst [smem:[#allocation14_spill]] %s3104_s0 }
   0x2   :  { %22 = vsyncpa [#allocation5], 0 }
   0x3   :  { %23 = vsyncpa [#allocation7], 0 }
   0x4   :  { %24 = vsyncpa [#allocation10], 0  ;;  %s2601_s21 = smov [#allocation6]   ;;  %s2602_s23 = smov [#allocation4]  }
   0x5   :  { %s54_s22 = sshll.u32 %s2601_s21, 4  ;;  %s42_s24 = sshll.u32 %s2602_s23, 4  ;;  %s55_s22 = int_to_ptr.vmem [resolvable:$true] %s54_s22  ;;  %s2697_s24 = int_to_ptr.vmem [resolvable:$true] %s42_s24 }
   0x6   :  { %s2507_s27 = scalar_lea.hbm %s3111_s7, 6912 }
   0x7   :  { %p2508_p0 = scmp.ne.s32.totalorder %s3111_s7, %s2507_s27  ;;  %p2511_p1 = scmp.lt.u32.totalorder %s2507_s27, %s3111_s7 }
   0x9   :  { %p2513_p2 = pnand %p2511_p1, %p2508_p0 }
   0xb   :  { %2516 = shalt.err (!%p2513_p2)
}
   0xc   :  { %s2517_s17 = scalar_lea.vmem %s55_s22, 6912  ;;  %p2522_p4 = scmp.lt.s32.totalorder %s55_s22, %s55_s22 }
   0xd   :  { %p2518_p3 = scmp.ne.s32.totalorder %s55_s22, %s2517_s17  ;;  %p2523_p5 = scmp.lt.s32.totalorder %s2517_s17, %s2517_s17 }
   0xf   :  { %p2524_p6 = por %p2523_p5, %p2522_p4 }
  0x11   :  { %p2525_p7 = pnand %p2524_p6, %p2518_p3 }
  0x13   :  { %2528 = shalt.err (!%p2525_p7)
}
  0x14   :  { %s2603_s18 = smov 64   ;;  %s2604_s19 = smov 4  }
  0x15   :  { %60 = dma.hbm_to_vmem [thread:$0]  %s3111_s7, 6912, %s55_s22, [#allocation7], %s2603_s18, %s2603_s18, %s2604_s19  }
  0x16   :  { %s2529_s26 = scalar_lea.hbm %s3110_s6, 256 }
  0x17   :  { %p2530_p8 = scmp.ne.s32.totalorder %s3110_s6, %s2529_s26  ;;  %p2533_p9 = scmp.lt.u32.totalorder %s2529_s26, %s3110_s6 }
  0x19   :  { %p2535_p10 = pnand %p2533_p9, %p2530_p8 }
  0x1b   :  { %2538 = shalt.err (!%p2535_p10)
}
  0x1c   :  { %s2539_s0 = scalar_lea.vmem %s2697_s24, 256  ;;  %p2544_p12 = scmp.lt.s32.totalorder %s2697_s24, %s2697_s24 }
  0x1d   :  { %p2540_p11 = scmp.ne.s32.totalorder %s2697_s24, %s2539_s0  ;;  %p2545_p13 = scmp.lt.s32.totalorder %s2539_s0, %s2539_s0 }
  0x1f   :  { %p2546_p0 = por %p2545_p13, %p2544_p12 }
  0x21   :  { %p2547_p1 = pnand %p2546_p0, %p2540_p11 }
  0x23   :  { %2550 = shalt.err (!%p2547_p1)
}
  0x24   :  { %48 = dma.hbm_to_vmem [thread:$0]  %s3110_s6, 256, %s2697_s24, [#allocation5], %s2603_s18, %s2603_s18, %s2604_s19  }
  0x25   :  { %s2605_s17 = smov [#allocation8]   ;;  %s2606_s21 = smov [#allocation9]  }
  0x26   :  { %s69_s20 = sshll.u32 %s2605_s17, 4  ;;  %s81_s23 = sshll.u32 %s2606_s21, 4  ;;  %s70_s20 = int_to_ptr.vmem [resolvable:$true] %s69_s20  ;;  %s82_s23 = int_to_ptr.vmem [resolvable:$true] %s81_s23 }
  0x27   :  { %s2551_s27 = scalar_lea.hbm %s3113_s9, 64 }
  0x28   :  { %p2552_p2 = scmp.ne.s32.totalorder %s3113_s9, %s2551_s27  ;;  %p2555_p3 = scmp.lt.u32.totalorder %s2551_s27, %s3113_s9 }
  0x2a   :  { %p2557_p4 = pnand %p2555_p3, %p2552_p2 }
  0x2c   :  { %2560 = shalt.err (!%p2557_p4)
}
  0x2d   :  { %s2561_s6 = scalar_lea.vmem %s70_s20, 64  ;;  %p2566_p6 = scmp.lt.s32.totalorder %s70_s20, %s70_s20 }
  0x2e   :  { %p2562_p5 = scmp.ne.s32.totalorder %s70_s20, %s2561_s6  ;;  %p2567_p7 = scmp.lt.s32.totalorder %s2561_s6, %s2561_s6 }
  0x30   :  { %p2568_p8 = por %p2567_p7, %p2566_p6 }
  0x32   :  { %p2569_p9 = pnand %p2568_p8, %p2562_p5 }
  0x34   :  { %2572 = shalt.err (!%p2569_p9)
}
  0x35   :  { %72 = dma.hbm_to_vmem [thread:$0]  %s3113_s9, 64, %s70_s20, [#allocation7]  }
  0x36   :  { %s2573_s17 = scalar_lea.hbm %s3115_s11, 16 }
  0x37   :  { %p2574_p10 = scmp.ne.s32.totalorder %s3115_s11, %s2573_s17  ;;  %p2577_p11 = scmp.lt.u32.totalorder %s2573_s17, %s3115_s11 }
  0x39   :  { %p2579_p12 = pnand %p2577_p11, %p2574_p10 }
  0x3b   :  { %2582 = shalt.err (!%p2579_p12)
}
  0x3c   :  { %s2583_s28 = scalar_lea.vmem %s82_s23, 16  ;;  %s2587_s29 = scalar_lea.vmem %s82_s23, 32 }
  0x3d   :  { %p2584_p13 = scmp.ne.s32.totalorder %s82_s23, %s2583_s28  ;;  %p2588_p0 = scmp.lt.s32.totalorder %s82_s23, %s82_s23 }
  0x3e   :  { %p2589_p1 = scmp.lt.s32.totalorder %s2587_s29, %s2583_s28 }
  0x40   :  { %p2590_p2 = por %p2589_p1, %p2588_p0 }
  0x42   :  { %p2591_p3 = pnand %p2590_p2, %p2584_p13 }
  0x44   :  { %2594 = shalt.err (!%p2591_p3)
}
  0x45   :  { %84 = dma.hbm_to_vmem [thread:$0]  %s3115_s11, 16, %s82_s23, [#allocation10]  }
  0x46   :  { %2595 = dma.done.wait [#allocation5], 256  }
  0x47   :  { %2596 = vsyncadd [#allocation5], 4294967040 }
  0x48   :  { %2597 = dma.done.wait [#allocation7], 6976  }
  0x49   :  { %2598 = vsyncadd [#allocation7], 4294960320 }
  0x4a   :  { %2599 = dma.done.wait [#allocation10], 16  }
  0x4b   :  { %2600 = vsyncadd [#allocation10], 4294967280  ;;  %v2607_v0 = vmov 0.0   ;;  %vm2608_vm0 = vmmov 0   ;;  %v2394_v1 = vld [vmem:[#allocation4] sm:$0xff]   ;;  %v2395_v2 = vld [vmem:[#allocation4 + $0x8] sm:$0xff]   ;;  %v171_v6 = vlaneseq }
  0x4c   :  { %2271 = vmatprep.subr.bf16.mxu0 %v2607_v0  ;;  %2275 = vmatprep.mubr.msk.bf16.mxu0 %vm2608_vm0, %v2607_v0  ;;  %v2045_v3 = vld [vmem:[%s3105_s1 + $0x8] sm:$0xff]  ;;  %vm121_vm1 = vcmask 261120   ;;  %s2609_s30 = smov 96   ;;  %v2610_v10 = vmov 1966171168   ;;  %v216_v28 = vld [vmem:[%s3108_s4] sm:$0xff] }
  0x4d   :  { %2279 = vmatprep.subr.bf16.mxu1 %v2607_v0  ;;  %2281 = vmatprep.mubr.msk.bf16.mxu1 %vm2608_vm0, %v2607_v0  ;;  %v2765_v4 = vld [vmem:[#allocation8 + $0x2] ss:$0 sm:$0xff]  ;;  %v104_v5 = vpack.c.bf16 %v2045_v3, %v2045_v3  ;;  %v172_v7 = vshrl.u32 %v171_v6, 7  ;;  %v339_v8 = vand.u32 127, %v171_v6  ;;  %v169_v11 = vunpack.c.l.s4 %v2610_v10  ;;  %v218_v32 = vld [vmem:[%s3108_s4 + $0x10] sm:$0xff]  ;;  %v220_v33 = vld [vmem:[%s3108_s4 + $0x20] sm:$0xff] }
  0x4e   :  { %2272 = vmatpush3.bf16.msra.mxu0 %v2394_v1  ;;  %293 = vrot.lane.b32.xlu0 %v2765_v4, %s2609_s30  ;;  %v217_v31 = vld [vmem:[%s3108_s4 + $0x8] sm:$0xff]  ;;  %v219_v44 = vld [vmem:[%s3108_s4 + $0x18] sm:$0xff]  ;;  %v222_v56 = vld [vmem:[%s3108_s4 + $0x30] sm:$0xff]  ;;  %vm372_vm2 = vcmask 1041409   ;;  %vm374_vm3 = vcmask 1042434   ;;  %vm376_vm4 = vcmask 1043459  }
  0x4f   :  { %2273 = vmatprep.subr.bf16.mxu0 %v2607_v0  ;;  %v2774_v9 = vsub.s32 %v339_v8, %v172_v7  ;;  %v170_v12 = vunpack.c.0.s8 %v169_v11  ;;  %v226_v18 = vsub.s32 0, %v172_v7  ;;  %v221_v51 = vld [vmem:[%s3108_s4 + $0x28] sm:$0xff]  ;;  %v223_v62 = vld [vmem:[%s3108_s4 + $0x38] sm:$0xff]  ;;  %vm378_vm5 = vcmask 1044484   ;;  %s3123_s23 = sld [smem:[#allocation14_spill]]  ;;  %s2611_s27 = smov 32  }
  0x50   :  { %vm380_vm6 = vcmask 1045509   ;;  %vm382_vm7 = vcmask 1046534   ;;  %vm384_vm8 = vcmask 1047559   ;;  %vm388_vm10 = vcmask 64512  }
  0x51   :  { %v2776_v13 = vsub.s32 %v170_v12, %v172_v7  ;;  %vm478_vm11 = vcmask 1043456   ;;  %vm1873_vm12 = vcmask 519168   ;;  %vm1019_vm13 = vcmask 523264  }
  0x52   :  { %2274 = vmatpush3.bf16.msra.mxu0 %v2395_v2  ;;  %vm1839_vm14 = vcmask 257024   ;;  %vm1830_vm15 = vcmask 7168  }
  0x53   :  { %2291 = vmatprep.subr.bf16.mxu0 %v2607_v0 }
  0x55   :  { %2276 = vmatmul.mubr.msk.bf16.vlgmr.msra.gmra.mrb[0].mxu0 %vm121_vm1, %v104_v5 }
  0x56   :  { %2293 = vmatprep.mubr.msk.bf16.mxu0 %vm2608_vm0, %v2607_v0 }
  0xc0   :  { %v294_v57 = vpop.permute.xlu0 %293 }
 0x128   :  { %v159_v14 = vpop.f32.mrb[0].mxu0 }
 0x129   :  { %v167_v15 = vcombine.high %v159_v14, %v159_v14  ;;  %v174_v16 = vrot.slane %v159_v14, %v2776_v13  ;;  %v2277_v17 = vpop.f32.mrb[1].mxu0 }
 0x12a   :  { %v162_v19 = vpop.f32.mrb[2].mxu0 }
 0x12b   :  { %v181_v20 = vrot.slane %v167_v15, %v2776_v13  ;;  %v182_v21 = vcombine.high %v174_v16, %v174_v16  ;;  %v190_v22 = vrot.slane %v174_v16, %v2776_v13  ;;  %v2278_v23 = vpop.f32.mrb[3].mxu0 }
 0x12d   :  { %v183_v24 = vcombine.high %v181_v20, %v181_v20  ;;  %v197_v25 = vrot.slane %v181_v20, %v2776_v13  ;;  %v204_v26 = vrot.slane %v182_v21, %v2776_v13  ;;  %v212_v27 = vcombine.high %v190_v22, %v190_v22 }
 0x12e   :  { %v227_v29 = vrot.slane %v190_v22, %v226_v18 }
 0x12f   :  { %v214_v30 = vcombine.high %v204_v26, %v204_v26  ;;  %v231_v34 = vrot.slane %v204_v26, %v226_v18  ;;  %v235_v35 = vrot.slane %v212_v27, %v226_v18  ;;  %v243_v36 = vrot.slane %v197_v25, %v226_v18 }
 0x130   :  { %v264_v37 = vadd.f32 %v227_v29, %v216_v28  ;;  %v211_v38 = vrot.slane %v183_v24, %v2776_v13  ;;  %v213_v47 = vcombine.high %v197_v25, %v197_v25 }
 0x131   :  { %v239_v39 = vrot.slane %v214_v30, %v226_v18  ;;  %v265_v40 = vadd.f32 %v231_v34, %v217_v31  ;;  %v266_v41 = vadd.f32 %v235_v35, %v218_v32  ;;  %v268_v42 = vadd.f32 %v243_v36, %v220_v33 }
 0x132   :  { %v276_v43 = vadd.f32 %v2765_v4, %v264_v37  ;;  %v247_v48 = vrot.slane %v211_v38, %v226_v18  ;;  %v215_v52 = vcombine.high %v211_v38, %v211_v38  ;;  %v251_v53 = vrot.slane %v213_v47, %v226_v18 }
 0x133   :  { %v277_v45 = vadd.f32 %v2765_v4, %v265_v40  ;;  %v278_v46 = vadd.f32 %v2765_v4, %v266_v41  ;;  %v267_v49 = vadd.f32 %v239_v39, %v219_v44  ;;  %v280_v50 = vadd.f32 %v2765_v4, %v268_v42 }
 0x134   :  { %2467 = vtanh.f32 %v276_v43  ;;  %v269_v54 = vadd.f32 %v247_v48, %v221_v51  ;;  %v255_v59 = vrot.slane %v215_v52, %v226_v18  ;;  %v270_v60 = vadd.f32 %v251_v53, %v222_v56 }
 0x135   :  { %2469 = vtanh.f32 %v277_v45  ;;  %v279_v55 = vadd.f32 %v2765_v4, %v267_v49  ;;  %v328_v45 = vld [vmem:[%s3109_s5] sm:$0xff] }
 0x136   :  { %2471 = vtanh.f32 %v278_v46  ;;  %v281_v61 = vadd.f32 %v2765_v4, %v269_v54  ;;  %v271_v6 = vadd.f32 %v255_v59, %v223_v62  ;;  %v282_v7 = vadd.f32 %v2765_v4, %v270_v60  ;;  %v469_v59 = vld [vmem:[%s3107_s3 + $0x8] sm:$0xf] }
 0x137   :  { %2473 = vtanh.f32 %v280_v50  ;;  %vm329_vm9 = vcmp.ne.f32.partialorder %v328_v45, 0.0  ;;  %v2405_v45 = vld [vmem:[#allocation6 + $0x20] sm:$0xff]  }
 0x138   :  { %2475 = vtanh.f32 %v279_v55  ;;  %v283_v12 = vadd.f32 %v2765_v4, %v271_v6 }
 0x139   :  { %2477 = vtanh.f32 %v281_v61  ;;  %v572_v61 = vsel %vm478_vm11, %v469_v59, 0  ;;  %v2419_v59 = vld [vmem:[#allocation6 + $0x110] sm:$0xff]  }
 0x13a   :  { %2479 = vtanh.f32 %v282_v7  ;;  %2292 = vmatpush3.bf16.msra.mxu0 %v572_v61  ;;  %v471_v7 = vld [vmem:[%s3107_s3 + $0x10] sm:$0xf] }
 0x13b   :  { %2481 = vtanh.f32 %v283_v12  ;;  %2303 = vmatprep.subr.bf16.mxu0 %v2607_v0  ;;  %v2421_v61 = vld [vmem:[#allocation6 + $0x118] sm:$0xff]  }
 0x13e   :  { %v2468_v58 = vpop.eup %2467 }
 0x13f   :  { %v296_v63 = vmul.f32 %v2468_v58, %v294_v57  ;;  %v2470_v1 = vpop.eup %2469 }
 0x140   :  { %v2472_v2 = vpop.eup %2471  ;;  %v297_v5 = vmul.f32 %v2470_v1, %v294_v57 }
 0x141   :  { %v304_v3 = vsel %vm121_vm1, %v296_v63, 0.0  ;;  %v298_v10 = vmul.f32 %v2472_v2, %v294_v57  ;;  %v2474_v11 = vpop.eup %2473 }
 0x142   :  { %305 = vadd.xlane.f32.xlu0 %v304_v3  ;;  %v307_v8 = vsel %vm121_vm1, %v297_v5, 0.0  ;;  %v300_v15 = vmul.f32 %v2474_v11, %v294_v57  ;;  %v2476_v16 = vpop.eup %2475  ;;  %v468_v3 = vld [vmem:[%s3107_s3 + $0x4] sm:$0xf] }
 0x143   :  { %308 = vadd.xlane.f32.xlu1 %v307_v8  ;;  %v310_v14 = vsel %vm121_vm1, %v298_v10, 0.0  ;;  %v299_v18 = vmul.f32 %v2476_v16, %v294_v57  ;;  %v2478_v19 = vpop.eup %2477  ;;  %v526_v12 = vsel %vm478_vm11, %v468_v3, 0  ;;  %v2426_v3 = vld [vmem:[#allocation6 + $0x190] sm:$0xff]  }
 0x144   :  { %v316_v17 = vsel %vm121_vm1, %v300_v15, 0.0  ;;  %v301_v21 = vmul.f32 %v2478_v19, %v294_v57  ;;  %v2480_v22 = vpop.eup %2479  ;;  %v664_v15 = vsel %vm478_vm11, %v471_v7, 0  ;;  %v2429_v7 = vld [vmem:[#allocation6 + $0x198] sm:$0xff]  }
 0x145   :  { %v313_v20 = vsel %vm121_vm1, %v299_v18, 0.0  ;;  %v302_v24 = vmul.f32 %v2480_v22, %v294_v57  ;;  %v2482_v4 = vpop.eup %2481  ;;  %v470_v18 = vld [vmem:[%s3107_s3 + $0xc] sm:$0xf] }
 0x146   :  { %v319_v23 = vsel %vm121_vm1, %v301_v21, 0.0  ;;  %v303_v26 = vmul.f32 %v2482_v4, %v294_v57  ;;  %v618_v22 = vsel %vm478_vm11, %v470_v18, 0  ;;  %v2437_v18 = vld [vmem:[%s3114_s10 + $0x18] sm:$0xff]  }
 0x147   :  { %311 = vadd.xlane.f32.xlu1 %v310_v14  ;;  %v322_v25 = vsel %vm121_vm1, %v302_v24, 0.0 }
 0x148   :  { %v325_v27 = vsel %vm121_vm1, %v303_v26, 0.0 }
 0x14b   :  { %317 = vadd.xlane.f32.xlu1 %v316_v17 }
 0x14f   :  { %314 = vadd.xlane.f32.xlu1 %v313_v20  ;;  %v473_v20 = vld [vmem:[%s3107_s3 + $0x18] sm:$0xf] }
 0x150   :  { %v756_v24 = vsel %vm478_vm11, %v473_v20, 0  ;;  %v2440_v20 = vld [vmem:[%s3114_s10 + $0x20] sm:$0xff]  }
 0x153   :  { %320 = vadd.xlane.f32.xlu1 %v319_v23 }
 0x157   :  { %323 = vadd.xlane.f32.xlu1 %v322_v25  ;;  %v472_v25 = vld [vmem:[%s3107_s3 + $0x14] sm:$0xf] }
 0x15b   :  { %326 = vadd.xlane.f32.xlu1 %v325_v27 }
 0x1cf   :  { %v306_v32 = vpop.xlane.xlu0 %305 }
 0x1d0   :  { %v309_v28 = vpop.xlane.xlu1 %308  ;;  %v343_v36 = vrot.slane %v306_v32, %v2774_v9  ;;  %v474_v32 = vld [vmem:[%s3107_s3 + $0x1c] sm:$0xf] }
 0x1d1   :  { %v347_v33 = vrot.slane %v309_v28, %v2774_v9  ;;  %v710_v28 = vsel %vm478_vm11, %v472_v25, 0 }
 0x1d3   :  { %v373_v38 = vsel %vm372_vm2, %v347_v33, %v343_v36  ;;  %v2397_v36 = vld [vmem:[#allocation6] sm:$0xff]  }
 0x1d4   :  { %v312_v29 = vpop.xlane.xlu1 %311 }
 0x1d5   :  { %v351_v34 = vrot.slane %v312_v29, %v2774_v9 }
 0x1d7   :  { %v375_v39 = vsel %vm374_vm3, %v351_v34, %v373_v38  ;;  %v802_v34 = vsel %vm478_vm11, %v474_v32, 0  ;;  %v2398_v38 = vld [vmem:[#allocation6 + $0x48] sm:$0xff]  }
 0x1d8   :  { %v318_v30 = vpop.xlane.xlu1 %317 }
 0x1d9   :  { %v359_v43 = vrot.slane %v318_v30, %v2774_v9 }
 0x1dc   :  { %v315_v31 = vpop.xlane.xlu1 %314 }
 0x1dd   :  { %v355_v37 = vrot.slane %v315_v31, %v2774_v9 }
 0x1df   :  { %v377_v41 = vsel %vm376_vm4, %v355_v37, %v375_v39  ;;  %v2399_v39 = vld [vmem:[#allocation6 + $0x8] sm:$0xff]  }
 0x1e0   :  { %v321_v35 = vpop.xlane.xlu1 %320  ;;  %v379_v46 = vsel %vm378_vm5, %v359_v43, %v377_v41  ;;  %v2401_v41 = vld [vmem:[#allocation6 + $0x10] sm:$0xff]   ;;  %v2403_v43 = vld [vmem:[#allocation6 + $0x18] sm:$0xff]  }
 0x1e1   :  { %v363_v42 = vrot.slane %v321_v35, %v2774_v9  ;;  %v2396_v35 = vld [vmem:[#allocation6 + $0x40] sm:$0xff]  }
 0x1e3   :  { %v381_v48 = vsel %vm380_vm6, %v363_v42, %v379_v46  ;;  %v2402_v42 = vld [vmem:[#allocation6 + $0x58] sm:$0xff]   ;;  %v2406_v46 = vld [vmem:[#allocation6 + $0x68] sm:$0xff]  }
 0x1e4   :  { %v324_v40 = vpop.xlane.xlu1 %323 }
 0x1e5   :  { %v367_v44 = vrot.slane %v324_v40, %v2774_v9  ;;  %v2400_v40 = vld [vmem:[#allocation6 + $0x50] sm:$0xff]  }
 0x1e7   :  { %v383_v50 = vsel %vm382_vm7, %v367_v44, %v381_v48  ;;  %v2404_v44 = vld [vmem:[#allocation6 + $0x60] sm:$0xff]   ;;  %v2408_v48 = vld [vmem:[#allocation6 + $0x70] sm:$0xff]  }
 0x1e8   :  { %v327_v47 = vpop.xlane.xlu1 %326 }
 0x1e9   :  { %v371_v49 = vrot.slane %v327_v47, %v2774_v9  ;;  %v467_v9 = vld [vmem:[%s3107_s3] sm:$0xf] }
 0x1ea   :  { %v480_v60 = vsel %vm478_vm11, %v467_v9, 0  ;;  %v2407_v47 = vld [vmem:[#allocation6 + $0x28] sm:$0xff]   ;;  %v2418_v9 = vld [vmem:[#allocation6 + $0x150] sm:$0xff]  }
 0x1eb   :  { %v385_v51 = vsel %vm384_vm8, %v371_v49, %v383_v50  ;;  %2280 = vmatpush3.bf16.msra.mxu1 %v480_v60  ;;  %v2409_v49 = vld [vmem:[#allocation6 + $0x30] sm:$0xff]   ;;  %v2410_v50 = vld [vmem:[#allocation6 + $0x78] sm:$0xff]  }
 0x1ec   :  { %v387_v52 = vsel %vm329_vm9, %v385_v51, -1e+30  ;;  %2285 = vmatprep.subr.bf16.mxu1 %v2607_v0  ;;  %v2411_v51 = vld [vmem:[#allocation6 + $0x38] sm:$0xff]  }
 0x1ed   :  { %v389_v53 = vsel %vm388_vm10, %v387_v52, -inf  ;;  %v2420_v60 = vld [vmem:[#allocation6 + $0x158] sm:$0xff]  }
 0x1ee   :  { %390 = vmax.xlane.f32.xlu1 %v389_v53 }
 0x27b   :  { %v391_v54 = vpop.xlane.xlu1 %390 }
 0x27c   :  { %v392_v55 = vsub.f32 %v387_v52, %v391_v54  ;;  %v844_v52 = vld [vmem:[%s3123_s23] sm:$0xff]  ;;  %v2414_v54 = vld [vmem:[#allocation6 + $0x140] sm:$0xff]  }
 0x27d   :  { %v2064_v53 = vcombine.high %v844_v52, %v844_v52 }
 0x27e   :  { %v393_v56 = vmul.f32 1.442695, %v392_v55  ;;  %v2063_v55 = vcombine.low %v844_v52, %v844_v52 }
 0x280   :  { %2483 = vpow2.f32 %v393_v56  ;;  %v2415_v56 = vld [vmem:[#allocation6 + $0x100] sm:$0xff]  }
 0x28a   :  { %v2484_v57 = vpop.eup %2483 }
 0x28b   :  { %v395_v58 = vsel %vm388_vm10, %v2484_v57, 0.0 }
 0x28c   :  { %396 = vadd.xlane.f32.xlu1 %v395_v58  ;;  %v2417_v58 = vld [vmem:[#allocation6 + $0x108] sm:$0xff]  }
 0x319   :  { %v397_v62 = vpop.xlane.xlu1 %396 }
 0x31a   :  { %2485 = vrcp.f32 %v397_v62  ;;  %v2422_v62 = vld [vmem:[#allocation6 + $0x160] sm:$0xff]  }
 0x324   :  { %v2486_v63 = vpop.eup %2485 }
 0x325   :  { %v399_v1 = vmul.f32 %v2486_v63, %v2484_v57  ;;  %v2416_v57 = vld [vmem:[#allocation6 + $0x148] sm:$0xff]   ;;  %v2423_v63 = vld [vmem:[#allocation6 + $0x120] sm:$0xff]  }
 0x327   :  { %400 = vst.msk [vmem:[%s3120_s16] sm:$0xff] %vm388_vm10, %v399_v1  ;;  %v409_v2 = vrot.slane %v399_v1, %v2776_v13  ;;  %v402_v5 = vcombine.high %v399_v1, %v399_v1  ;;  %v2424_v1 = vld [vmem:[#allocation6 + $0x168] sm:$0xff]  }
 0x329   :  { %v425_v6 = vrot.slane %v409_v2, %v2776_v13  ;;  %v417_v8 = vcombine.high %v409_v2, %v409_v2  ;;  %v416_v16 = vrot.slane %v402_v5, %v2776_v13  ;;  %v2425_v2 = vld [vmem:[#allocation6 + $0x128] sm:$0xff]   ;;  %v2427_v5 = vld [vmem:[#allocation6 + $0x170] sm:$0xff]  }
 0x32b   :  { %v447_v10 = vcombine.high %v425_v6, %v425_v6  ;;  %v459_v11 = vpack.c.bf16 %v425_v6, %v425_v6  ;;  %v439_v17 = vrot.slane %v417_v8, %v2776_v13  ;;  %v432_v19 = vrot.slane %v416_v16, %v2776_v13  ;;  %v2428_v6 = vld [vmem:[#allocation6 + $0x130] sm:$0xff]   ;;  %v2430_v8 = vld [vmem:[#allocation6 + $0x178] sm:$0xff]  }
 0x32c   :  { %v418_v29 = vcombine.high %v416_v16, %v416_v16  ;;  %v2435_v16 = vld [vmem:[%s3114_s10 + $0x10] sm:$0xff]  }
 0x32d   :  { %2282 = vmatmul.mubr.msk.bf16.vlgmr.msra.gmra.mrb[0].mxu1 %vm388_vm10, %v459_v11  ;;  %v461_v14 = vpack.c.bf16 %v447_v10, %v447_v10  ;;  %v460_v21 = vpack.c.bf16 %v439_v17, %v439_v17  ;;  %v463_v23 = vpack.c.bf16 %v432_v19, %v432_v19  ;;  %v449_v4 = vcombine.high %v439_v17, %v439_v17  ;;  %v2431_v10 = vld [vmem:[#allocation6 + $0x138] sm:$0xff]   ;;  %v2436_v17 = vld [vmem:[#allocation6 + $0x1a8] sm:$0xff]  }
 0x32e   :  { %2286 = vmatpush3.bf16.msra.mxu1 %v526_v12  ;;  %2287 = vmatprep.mubr.msk.bf16.mxu1 %vm2608_vm0, %v2607_v0  ;;  %v448_v26 = vcombine.high %v432_v19, %v432_v19  ;;  %v446_v31 = vrot.slane %v418_v29, %v2776_v13  ;;  %v846_v11 = vld [vmem:[%s3123_s23 + $0x10] sm:$0xff]  ;;  %v2432_v12 = vld [vmem:[#allocation6 + $0x1a0] sm:$0xff]  }
 0x32f   :  { %2294 = vmatmul.mubr.msk.bf16.vlgmr.msra.gmra.mrb[4].mxu0 %vm388_vm10, %v461_v14  ;;  %2297 = vmatprep.subr.bf16.mxu1 %v2607_v0  ;;  %v462_v27 = vpack.c.bf16 %v449_v4, %v449_v4  ;;  %v2068_v14 = vcombine.high %v846_v11, %v846_v11  ;;  %v2438_v19 = vld [vmem:[#allocation6 + $0xc0] sm:$0xff]  }
 0x330   :  { %2304 = vmatpush3.bf16.msra.mxu0 %v664_v15  ;;  %2305 = vmatprep.mubr.msk.bf16.mxu0 %vm2608_vm0, %v2607_v0  ;;  %v465_v30 = vpack.c.bf16 %v448_v26, %v448_v26  ;;  %v464_v33 = vpack.c.bf16 %v446_v31, %v446_v31  ;;  %v450_v13 = vcombine.high %v446_v31, %v446_v31 }
 0x331   :  { %2315 = vmatprep.subr.bf16.mxu0 %v2607_v0  ;;  %v2067_v15 = vcombine.low %v846_v11, %v846_v11 }
 0x332   :  { %v466_v37 = vpack.c.bf16 %v450_v13, %v450_v13 }
 0x335   :  { %2288 = vmatmul.mubr.msk.bf16.vlgmr.msra.gmra.mrb[4].mxu1 %vm388_vm10, %v460_v21  ;;  %v2443_v21 = vld [vmem:[%s3114_s10 + $0x28] sm:$0xff]  }
 0x336   :  { %2298 = vmatpush3.bf16.msra.mxu1 %v618_v22  ;;  %2299 = vmatprep.mubr.msk.bf16.mxu1 %vm2608_vm0, %v2607_v0  ;;  %v1563_v22 = vld [vmem:[%s3106_s2] sm:$0xff] }
 0x337   :  { %2306 = vmatmul.mubr.msk.bf16.vlgmr.msra.gmra.mrb[8].mxu0 %vm388_vm10, %v463_v23  ;;  %2309 = vmatprep.subr.bf16.mxu1 %v2607_v0 }
 0x338   :  { %2316 = vmatpush3.bf16.msra.mxu0 %v756_v24  ;;  %2317 = vmatprep.mubr.msk.bf16.mxu0 %vm2608_vm0, %v2607_v0 }
 0x339   :  { %2327 = vmatprep.subr.bf16.mxu0 %v2607_v0  ;;  %1565 = vrot.lane.b32.xlu1 %v1563_v22, %s2611_s27 }
 0x33d   :  { %2300 = vmatmul.mubr.msk.bf16.vlgmr.msra.gmra.mrb[8].mxu1 %vm388_vm10, %v462_v27 }
 0x33e   :  { %2310 = vmatpush3.bf16.msra.mxu1 %v710_v28  ;;  %2311 = vmatprep.mubr.msk.bf16.mxu1 %vm2608_vm0, %v2607_v0 }
 0x33f   :  { %2318 = vmatmul.mubr.msk.bf16.vlgmr.msra.gmra.mrb[12].mxu0 %vm388_vm10, %v465_v30  ;;  %2321 = vmatprep.subr.bf16.mxu1 %v2607_v0 }
 0x340   :  { %2335 = vmatprep.mubr.msk.bf16.mxu0 %vm2608_vm0, %v2607_v0  ;;  %2328 = vmatpush3.bf16.msra.mxu0 %v2426_v3 }
 0x341   :  { %2329 = vmatprep.subr.bf16.mxu0 %v2607_v0 }
 0x344   :  { %2330 = vmatpush3.bf16.msra.mxu0 %v2429_v7 }
 0x345   :  { %2312 = vmatmul.mubr.msk.bf16.vlgmr.msra.gmra.mrb[12].mxu1 %vm388_vm10, %v464_v33  ;;  %2331 = vmatprep.subr.bf16.mxu0 %v2607_v0 }
 0x346   :  { %2322 = vmatpush3.bf16.msra.mxu1 %v802_v34  ;;  %2323 = vmatprep.mubr.msk.bf16.mxu1 %vm2608_vm0, %v2607_v0 }
 0x347   :  { %2188 = vmatprep.subr.bf16.mxu1 %v2396_v35 }
 0x348   :  { %2332 = vmatpush3.bf16.msra.mxu0 %v2432_v12 }
 0x349   :  { %2333 = vmatprep.subr.bf16.mxu0 %v2607_v0 }
 0x34c   :  { %2334 = vmatpush3.bf16.msra.mxu0 %v2436_v17 }
 0x34d   :  { %2324 = vmatmul.mubr.msk.bf16.vlgmr.msra.gmra.mrb[16].mxu1 %vm388_vm10, %v466_v37  ;;  %2210 = vmatprep.subr.bf16.mxu0 %v2438_v19 }
 0x34e   :  { %2189 = vmatpush3.bf16.msra.mxu1 %v2397_v36  ;;  %1422 = vmatprep.mubr.bf16.mxu1 %v2064_v53 }
 0x34f   :  { %2190 = vmatprep.subr.bf16.mxu1 %v2398_v38 }
 0x352   :  { %2191 = vmatpush3.bf16.msra.mxu1 %v2399_v39 }
 0x353   :  { %2192 = vmatprep.subr.bf16.mxu1 %v2400_v40 }
 0x356   :  { %2193 = vmatpush3.bf16.msra.mxu1 %v2401_v41 }
 0x357   :  { %2194 = vmatprep.subr.bf16.mxu1 %v2402_v42 }
 0x35a   :  { %2195 = vmatpush3.bf16.msra.mxu1 %v2403_v43 }
 0x35b   :  { %2196 = vmatprep.subr.bf16.mxu1 %v2404_v44 }
 0x35e   :  { %2197 = vmatpush3.bf16.msra.mxu1 %v2405_v45 }
 0x35f   :  { %2198 = vmatprep.subr.bf16.mxu1 %v2406_v46 }
 0x362   :  { %2199 = vmatpush3.bf16.msra.mxu1 %v2407_v47 }
 0x363   :  { %2200 = vmatprep.subr.bf16.mxu1 %v2408_v48 }
 0x366   :  { %2201 = vmatpush3.bf16.msra.mxu1 %v2409_v49 }
 0x367   :  { %2202 = vmatprep.subr.bf16.mxu1 %v2410_v50 }
 0x36a   :  { %2203 = vmatpush3.bf16.msra.mxu1 %v2411_v51 }
 0x36b   :  { %2232 = vmatprep.subr.bf16.mxu1 %v2414_v54 }
 0x36d   :  { %1423 = vmatmul.mubr.bf16.vlgmr.msra.gmra.mrb[20].mxu1 %v2063_v55 }
 0x36e   :  { %2233 = vmatpush3.bf16.msra.mxu1 %v2415_v56  ;;  %1502 = vmatprep.mubr.bf16.mxu1 %v2068_v14 }
 0x36f   :  { %2234 = vmatprep.subr.bf16.mxu1 %v2416_v57 }
 0x372   :  { %2235 = vmatpush3.bf16.msra.mxu1 %v2417_v58 }
 0x373   :  { %2236 = vmatprep.subr.bf16.mxu1 %v2418_v9 }
 0x376   :  { %2237 = vmatpush3.bf16.msra.mxu1 %v2419_v59 }
 0x377   :  { %2238 = vmatprep.subr.bf16.mxu1 %v2420_v60 }
 0x37a   :  { %2239 = vmatpush3.bf16.msra.mxu1 %v2421_v61 }
 0x37b   :  { %2240 = vmatprep.subr.bf16.mxu1 %v2422_v62 }
 0x37e   :  { %2241 = vmatpush3.bf16.msra.mxu1 %v2423_v63 }
 0x37f   :  { %2242 = vmatprep.subr.bf16.mxu1 %v2424_v1 }
 0x382   :  { %2243 = vmatpush3.bf16.msra.mxu1 %v2425_v2 }
 0x383   :  { %2244 = vmatprep.subr.bf16.mxu1 %v2427_v5 }
 0x386   :  { %2245 = vmatpush3.bf16.msra.mxu1 %v2428_v6 }
 0x387   :  { %2246 = vmatprep.subr.bf16.mxu1 %v2430_v8 }
 0x38a   :  { %2247 = vmatpush3.bf16.msra.mxu1 %v2431_v10 }
 0x38b   :  { %2363 = vmatprep.subr.bf16.mxu1 %v2607_v0 }
 0x38d   :  { %1503 = vmatmul.mubr.bf16.vlgmr.msra.gmra.mrb[24].mxu1 %v2067_v15 }
 0x38e   :  { %2364 = vmatpush3.bf16.msra.mxu1 %v2435_v16  ;;  %2371 = vmatprep.mubr.msk.bf16.mxu1 %vm2608_vm0, %v2607_v0 }
 0x38f   :  { %2365 = vmatprep.subr.bf16.mxu1 %v2607_v0 }
 0x392   :  { %2366 = vmatpush3.bf16.msra.mxu1 %v2437_v18 }
 0x393   :  { %2367 = vmatprep.subr.bf16.mxu1 %v2607_v0 }
 0x396   :  { %2368 = vmatpush3.bf16.msra.mxu1 %v2440_v20  ;;  %v845_v20 = vld [vmem:[%s3123_s23 + $0x8] sm:$0xff] }
 0x397   :  { %2369 = vmatprep.subr.bf16.mxu1 %v2607_v0 }
 0x39a   :  { %2370 = vmatpush3.bf16.msra.mxu1 %v2443_v21 }
 0x400   :  { %v2946_v23 = vpop.f32.mrb[0].mxu1 }
 0x401   :  { %v2283_v24 = vpop.f32.mrb[1].mxu1  ;;  %v948_v32 = vpack.c.bf16 %v2946_v23, %v2946_v23 }
 0x402   :  { %v519_v4 = vpop.f32.mrb[2].mxu1  ;;  %v2948_v25 = vpop.f32.mrb[4].mxu0  ;;  %v2439_v24 = vld [vmem:[#allocation6 + $0x80] sm:$0xff]  }
 0x403   :  { %v2284_v26 = vpop.f32.mrb[3].mxu1  ;;  %v2295_v27 = vpop.f32.mrb[5].mxu0  ;;  %v950_v30 = vpack.c.bf16 %v2948_v25, %v2948_v25  ;;  %v972_v41 = vunpack.c.l.b16 %v948_v32  ;;  %v2066_v4 = vcombine.high %v845_v20, %v845_v20  ;;  %v2446_v32 = vld [vmem:[#allocation6 + $0xd8] sm:$0xff]  }
 0x404   :  { %v611_v28 = vpop.f32.mrb[6].mxu0  ;;  %v2441_v27 = vld [vmem:[#allocation6 + $0xc8] sm:$0xff]  }
 0x405   :  { %v2296_v29 = vpop.f32.mrb[7].mxu0  ;;  %v974_v35 = vunpack.c.l.b16 %v950_v30  ;;  %v2442_v28 = vld [vmem:[#allocation6 + $0x88] sm:$0xff]   ;;  %v2445_v30 = vld [vmem:[#allocation6 + $0x90] sm:$0xff]  }
 0x406   :  { %v2444_v29 = vld [vmem:[#allocation6 + $0xd0] sm:$0xff]  }
 0x407   :  { %v982_v44 = vrot.slane %v974_v35, 6  ;;  %v2448_v35 = vld [vmem:[#allocation6 + $0xe0] sm:$0xff]  }
 0x408   :  { %v2952_v31 = vpop.f32.mrb[4].mxu1 }
 0x409   :  { %v949_v33 = vpack.c.bf16 %v2952_v31, %v2952_v31  ;;  %v2289_v34 = vpop.f32.mrb[5].mxu1 }
 0x40a   :  { %v565_v13 = vpop.f32.mrb[6].mxu1  ;;  %v2958_v36 = vpop.f32.mrb[8].mxu0  ;;  %v2447_v34 = vld [vmem:[#allocation6 + $0x98] sm:$0xff]  }
 0x40b   :  { %v973_v37 = vunpack.c.l.b16 %v949_v33  ;;  %v2290_v38 = vpop.f32.mrb[7].mxu1  ;;  %v2307_v39 = vpop.f32.mrb[9].mxu0  ;;  %v952_v45 = vpack.c.bf16 %v2958_v36, %v2958_v36  ;;  %v2449_v13 = vld [vmem:[#allocation6 + $0xa0] sm:$0xff]  }
 0x40c   :  { %v703_v40 = vpop.f32.mrb[10].mxu0  ;;  %v2451_v38 = vld [vmem:[#allocation6 + $0xa8] sm:$0xff]   ;;  %v2452_v39 = vld [vmem:[#allocation6 + $0xf0] sm:$0xff]  }
 0x40d   :  { %v980_v42 = vrot.slane %v973_v37, 7  ;;  %v2308_v43 = vpop.f32.mrb[11].mxu0  ;;  %v976_v51 = vunpack.c.l.b16 %v952_v45  ;;  %v2450_v37 = vld [vmem:[#allocation6 + $0xe8] sm:$0xff]   ;;  %v2453_v40 = vld [vmem:[#allocation6 + $0xb0] sm:$0xff]  }
 0x40e   :  { %v2065_v43 = vcombine.low %v845_v20, %v845_v20  ;;  %v2459_v45 = vld [vmem:[#allocation6 + $0x188] sm:$0xff]  }
 0x40f   :  { %v981_v46 = vsel %vm372_vm2, %v980_v42, %v972_v41  ;;  %v986_v59 = vrot.slane %v976_v51, 4  ;;  %v2454_v41 = vld [vmem:[#allocation6 + $0xf8] sm:$0xff]  }
 0x410   :  { %v2963_v47 = vpop.f32.mrb[8].mxu1  ;;  %v983_v48 = vsel %vm374_vm3, %v982_v44, %v981_v46  ;;  %v2455_v42 = vld [vmem:[#allocation6 + $0xb8] sm:$0xff]   ;;  %v2458_v44 = vld [vmem:[#allocation6 + $0x180] sm:$0xff]  }
 0x411   :  { %v951_v49 = vpack.c.bf16 %v2963_v47, %v2963_v47  ;;  %v2301_v50 = vpop.f32.mrb[9].mxu1  ;;  %v2460_v46 = vld [vmem:[%s3123_s23 + $0x18] ss:$0 sps:$4 sm:$0xff]  }
 0x412   :  { %v657_v52 = vpop.f32.mrb[10].mxu1  ;;  %v2968_v53 = vpop.f32.mrb[12].mxu0 }
 0x413   :  { %v975_v54 = vunpack.c.l.b16 %v951_v49  ;;  %v2302_v55 = vpop.f32.mrb[11].mxu1  ;;  %v2319_v56 = vpop.f32.mrb[13].mxu0  ;;  %v954_v60 = vpack.c.bf16 %v2968_v53, %v2968_v53 }
 0x414   :  { %v795_v57 = vpop.f32.mrb[14].mxu0 }
 0x415   :  { %v984_v58 = vrot.slane %v975_v54, 5  ;;  %v2320_v9 = vpop.f32.mrb[15].mxu0  ;;  %v978_v3 = vunpack.c.l.b16 %v954_v60 }
 0x417   :  { %v985_v61 = vsel %vm376_vm4, %v984_v58, %v983_v48  ;;  %v990_v10 = vrot.slane %v978_v3, 2 }
 0x418   :  { %v2973_v62 = vpop.f32.mrb[12].mxu1  ;;  %v987_v63 = vsel %vm378_vm5, %v986_v59, %v985_v61 }
 0x419   :  { %v953_v1 = vpack.c.bf16 %v2973_v62, %v2973_v62  ;;  %v2313_v2 = vpop.f32.mrb[13].mxu1 }
 0x41a   :  { %v749_v5 = vpop.f32.mrb[14].mxu1 }
 0x41b   :  { %v977_v6 = vunpack.c.l.b16 %v953_v1  ;;  %v2314_v7 = vpop.f32.mrb[15].mxu1 }
 0x41d   :  { %v988_v8 = vrot.slane %v977_v6, 3 }
 0x41f   :  { %v989_v11 = vsel %vm380_vm6, %v988_v8, %v987_v63 }
 0x420   :  { %v2979_v12 = vpop.f32.mrb[16].mxu1  ;;  %v991_v14 = vsel %vm382_vm7, %v990_v10, %v989_v11 }
 0x421   :  { %v955_v15 = vpack.c.bf16 %v2979_v12, %v2979_v12  ;;  %v2325_v16 = vpop.f32.mrb[17].mxu1 }
 0x422   :  { %v841_v17 = vpop.f32.mrb[18].mxu1 }
 0x423   :  { %v979_v18 = vunpack.c.l.b16 %v955_v15  ;;  %v2326_v19 = vpop.f32.mrb[19].mxu1  ;;  %v2121_v17 = vld [vmem:[#allocation8] ss:$0 sm:$0xff] }
 0x425   :  { %v992_v21 = vrot.slane %v979_v18, 1 }
 0x427   :  { %v993_v22 = vsel %vm384_vm8, %v992_v21, %v991_v14 }
 0x428   :  { %v994_v26 = vpack.c.b16 %v993_v22, %v993_v22 }
 0x42a   :  { %1874 = vst.msk [vmem:[#allocation3] sm:$0xf] %vm1873_vm12, %v994_v26  ;;  %2336 = vmatmul.mubr.msk.bf16.vlgmr.msra.gmra.mrb[16].mxu0 %vm1019_vm13, %v994_v26 }
 0x42b   :  { %2211 = vmatpush3.bf16.msra.mxu0 %v2439_v24  ;;  %1462 = vmatprep.mubr.bf16.mxu0 %v2066_v4 }
 0x42c   :  { %2212 = vmatprep.subr.bf16.mxu0 %v2441_v27 }
 0x42f   :  { %2213 = vmatpush3.bf16.msra.mxu0 %v2442_v28 }
 0x430   :  { %2214 = vmatprep.subr.bf16.mxu0 %v2444_v29 }
 0x431   :  { %v1880_v33 = vld [vmem:[#allocation3] sm:$0xf] }
 0x432   :  { %2372 = vmatmul.mubr.msk.bf16.vlgmr.msra.gmra.mrb[28].mxu1 %vm1019_vm13, %v1880_v33 }
 0x433   :  { %2215 = vmatpush3.bf16.msra.mxu0 %v2445_v30 }
 0x434   :  { %2216 = vmatprep.subr.bf16.mxu0 %v2446_v32  ;;  %v1566_v32 = vpop.permute.xlu1 %1565 }
 0x437   :  { %2217 = vmatpush3.bf16.msra.mxu0 %v2447_v34 }
 0x438   :  { %2218 = vmatprep.subr.bf16.mxu0 %v2448_v35 }
 0x43b   :  { %2219 = vmatpush3.bf16.msra.mxu0 %v2449_v13  ;;  %v2461_v13 = vld [vmem:[%s3112_s8 + $0x10] sm:$0xff]  }
 0x43c   :  { %2220 = vmatprep.subr.bf16.mxu0 %v2450_v37  ;;  %v2462_v37 = vld [vmem:[%s3112_s8 + $0x18] sm:$0xff]  }
 0x43f   :  { %2221 = vmatpush3.bf16.msra.mxu0 %v2451_v38  ;;  %v2123_v38 = vld [vmem:[%s3105_s1 + $0x8] sm:$0xff] }
 0x440   :  { %2222 = vmatprep.subr.bf16.mxu0 %v2452_v39  ;;  %v2204_v48 = vpop.f32.mrb[20].mxu1  ;;  %v1601_v39 = vpack.c.bf16 %v2123_v38, %v2123_v38 }
 0x441   :  { %v2205_v49 = vpop.f32.mrb[21].mxu1 }
 0x442   :  { %v2206_v50 = vadd.f32 %v2205_v49, %v2204_v48  ;;  %v2207_v51 = vpop.f32.mrb[22].mxu1 }
 0x443   :  { %2223 = vmatpush3.bf16.msra.mxu0 %v2453_v40  ;;  %v2208_v52 = vpop.f32.mrb[23].mxu1  ;;  %v2463_v40 = vld [vmem:[%s3112_s8] sm:$0xff]  }
 0x444   :  { %2224 = vmatprep.subr.bf16.mxu0 %v2454_v41 }
 0x447   :  { %2225 = vmatpush3.bf16.msra.mxu0 %v2455_v42  ;;  %v2464_v42 = vld [vmem:[%s3112_s8 + $0x8] sm:$0xff]  }
 0x448   :  { %2339 = vmatprep.subr.bf16.mxu0 %v2607_v0 }
 0x44a   :  { %1463 = vmatmul.mubr.bf16.vlgmr.msra.gmra.mrb[20].mxu0 %v2065_v43 }
 0x44b   :  { %2340 = vmatpush3.bf16.msra.mxu0 %v2458_v44  ;;  %2343 = vmatprep.mubr.msk.bf16.mxu0 %vm2608_vm0, %v2607_v0 }
 0x44c   :  { %2341 = vmatprep.subr.bf16.mxu0 %v2607_v0 }
 0x44f   :  { %2342 = vmatpush3.bf16.msra.mxu0 %v2459_v45 }
 0x450   :  { %2347 = vmatprep.subr.bf16.mxu0 %v2607_v0 }
 0x452   :  { %2344 = vmatmul.mubr.msk.bf16.vlgmr.msra.gmra.mrb[24].mxu0 %vm121_vm1, %v2460_v46  ;;  %v2132_v46 = vld [vmem:[%s3106_s2 + $0x8] sm:$0xff] }
 0x453   :  { %2351 = vmatprep.mubr.msk.bf16.mxu0 %vm2608_vm0, %v2607_v0  ;;  %2348 = vmatpush3.bf16.msra.mxu0 %v2461_v13 }
 0x454   :  { %2349 = vmatprep.subr.bf16.mxu0 %v2607_v0 }
 0x457   :  { %2350 = vmatpush3.bf16.msra.mxu0 %v2462_v37 }
 0x458   :  { %2355 = vmatprep.subr.bf16.mxu0 %v2607_v0 }
 0x45a   :  { %2352 = vmatmul.mubr.msk.bf16.vlgmr.msra.gmra.mrb[28].mxu0 %vm121_vm1, %v1601_v39 }
 0x45b   :  { %2356 = vmatpush3.bf16.msra.mxu0 %v2463_v40  ;;  %2359 = vmatprep.mubr.msk.bf16.mxu0 %vm2608_vm0, %v2607_v0 }
 0x45c   :  { %2357 = vmatprep.subr.bf16.mxu0 %v2607_v0 }
 0x45f   :  { %2358 = vmatpush3.bf16.msra.mxu0 %v2464_v42 }
 0x460   :  { %v2248_v54 = vpop.f32.mrb[24].mxu1  ;;  %2375 = vmatprep.subr.bf16.mxu0 %v2607_v0 }
 0x461   :  { %v2249_v55 = vpop.f32.mrb[25].mxu1 }
 0x462   :  { %v2250_v56 = vadd.f32 %v2249_v55, %v2248_v54  ;;  %v2251_v57 = vpop.f32.mrb[26].mxu1  ;;  %v2130_v55 = vld [vmem:[#allocation8 + $0x1] ss:$0 sm:$0xff] }
 0x463   :  { %v2252_v58 = vpop.f32.mrb[27].mxu1 }
 0x4fd   :  { %v1057_v9 = vpop.f32.mrb[16].mxu0 }
 0x4fe   :  { %v1425_v59 = vadd.f32 %v2206_v50, %v1057_v9  ;;  %v2337_v60 = vpop.f32.mrb[17].mxu0 }
 0x4ff   :  { %v1060_v61 = vpop.f32.mrb[18].mxu0 }
 0x500   :  { %v2338_v63 = vpop.f32.mrb[19].mxu0 }
 0x505   :  { %v3001_v1 = vpop.f32.mrb[28].mxu1 }
 0x506   :  { %v2373_v2 = vpop.f32.mrb[29].mxu1 }
 0x507   :  { %v1954_v3 = vpop.f32.mrb[30].mxu1 }
 0x508   :  { %v2374_v5 = vpop.f32.mrb[31].mxu1 }
 0x51d   :  { %v2226_v6 = vpop.f32.mrb[20].mxu0 }
 0x51e   :  { %v2227_v7 = vpop.f32.mrb[21].mxu0 }
 0x51f   :  { %v2228_v8 = vadd.f32 %v2227_v7, %v2226_v6  ;;  %v2229_v10 = vpop.f32.mrb[22].mxu0 }
 0x520   :  { %v2230_v11 = vpop.f32.mrb[23].mxu0 }
 0x521   :  { %v1465_v14 = vadd.f32 %v2228_v8, %v1425_v59 }
 0x523   :  { %v1505_v15 = vadd.f32 %v2250_v56, %v1465_v14 }
 0x525   :  { %v1544_v16 = vpop.f32.mrb[24].mxu0 }
 0x526   :  { %v1545_v18 = vadd.f32 %v1544_v16, %v1505_v15  ;;  %v2345_v19 = vpop.f32.mrb[25].mxu0  ;;  %v2135_v15 = vld [vmem:[#allocation8 + $0x3] ss:$0 sm:$0xff]  ;;  %v2465_v16 = vld [vmem:[%s3114_s10] sm:$0xff]  }
 0x527   :  { %v1547_v20 = vpop.f32.mrb[26].mxu0 }
 0x528   :  { %v1555_v21 = vadd.f32 %v2121_v17, %v1545_v18  ;;  %v2346_v22 = vpop.f32.mrb[27].mxu0  ;;  %v2466_v17 = vld [vmem:[%s3114_s10 + $0x8] sm:$0xff]  }
 0x52a   :  { %2487 = vtanh.f32 %v1555_v21  ;;  %v2122_v4 = vmul.f32 -1.442695, %v1555_v21 }
 0x52c   :  { %2489 = vpow2.f32 %v2122_v4 }
 0x52d   :  { %v1655_v48 = vpop.f32.mrb[28].mxu0 }
 0x52e   :  { %v2353_v49 = vpop.f32.mrb[29].mxu0 }
 0x52f   :  { %v1658_v50 = vpop.f32.mrb[30].mxu0 }
 0x530   :  { %v2354_v51 = vpop.f32.mrb[31].mxu0 }
 0x534   :  { %v2488_v24 = vpop.eup %2487 }
 0x535   :  { %1570 = vrot.lane.b32.xlu0 %v2488_v24, %s2603_s18 }
 0x536   :  { %v2490_v26 = vpop.eup %2489 }
 0x537   :  { %v1559_v27 = vadd.f32 1.0, %v2490_v26 }
 0x539   :  { %2491 = vrcp.f32 %v1559_v27 }
 0x543   :  { %v2492_v28 = vpop.eup %2491 }
 0x544   :  { %v1568_v33 = vmul.f32 %v2492_v28, %v1566_v32 }
 0x5a7   :  { %v1571_v29 = vpop.permute.xlu0 %1570 }
 0x5a8   :  { %v1573_v30 = vmul.f32 %v2492_v28, %v1571_v29 }
 0x5aa   :  { %1575 = vrot.lane.b32.xlu1 %v1573_v30, %s2611_s27 }
 0x61c   :  { %v1576_v34 = vpop.permute.xlu1 %1575 }
 0x61d   :  { %v3005_v35 = vadd.f32 %v1576_v34, %v1568_v33 }
 0x61f   :  { %2493 = vtanh.f32 %v3005_v35 }
 0x629   :  { %v2494_v41 = vpop.eup %2493 }
 0x62a   :  { %1581 = vrot.lane.b32.xlu0 %v2494_v41, %s2603_s18 }
 0x69c   :  { %v1582_v43 = vpop.permute.xlu0 %1581 }
 0x69d   :  { %v3031_v44 = vmul.f32 %v2492_v28, %v1582_v43 }
 0x69f   :  { %v1595_v45 = vpack.c.bf16 %v3031_v44, %v3031_v44 }
 0x6a1   :  { %1662 = vrot.lane.b32.xlu1 %v1595_v45, %s2611_s27 }
 0x6a5   :  { %1735 = vrot.lane.b32.xlu1 %v2132_v46, %s2611_s27 }
 0x713   :  { %v1663_v52 = vpop.permute.xlu1 %1662 }
 0x714   :  { %2360 = vmatmul.mubr.msk.bf16.vlgmr.msra.gmra.mrb[32].mxu0 %vm121_vm1, %v1663_v52 }
 0x715   :  { %2379 = vmatprep.mubr.msk.bf16.mxu0 %vm2608_vm0, %v2607_v0  ;;  %2376 = vmatpush3.bf16.msra.mxu0 %v2465_v16 }
 0x716   :  { %2377 = vmatprep.subr.bf16.mxu0 %v2607_v0 }
 0x717   :  { %v1736_v7 = vpop.permute.xlu1 %1735 }
 0x719   :  { %2378 = vmatpush3.bf16.msra.mxu0 %v2466_v17 }
 0x7e7   :  { %v1713_v54 = vpop.f32.mrb[32].mxu0 }
 0x7e8   :  { %v1714_v56 = vadd.f32 %v1713_v54, %v1655_v48  ;;  %v2361_v57 = vpop.f32.mrb[33].mxu0 }
 0x7e9   :  { %v1716_v58 = vpop.f32.mrb[34].mxu0 }
 0x7ea   :  { %v1724_v9 = vadd.f32 %v2130_v55, %v1714_v56  ;;  %v2362_v59 = vpop.f32.mrb[35].mxu0  ;;  %v2154_v58 = vld [vmem:[#allocation9] ss:$0 sm:$0xff] }
 0x7ec   :  { %2495 = vtanh.f32 %v1724_v9  ;;  %v2131_v61 = vmul.f32 -1.442695, %v1724_v9 }
 0x7ee   :  { %2497 = vpow2.f32 %v2131_v61 }
 0x7f6   :  { %v2496_v60 = vpop.eup %2495 }
 0x7f7   :  { %1740 = vrot.lane.b32.xlu0 %v2496_v60, %s2603_s18 }
 0x7f8   :  { %v2498_v63 = vpop.eup %2497 }
 0x7f9   :  { %v1728_v2 = vadd.f32 1.0, %v2498_v63 }
 0x7fb   :  { %2499 = vrcp.f32 %v1728_v2 }
 0x805   :  { %v2500_v3 = vpop.eup %2499 }
 0x806   :  { %v1738_v8 = vmul.f32 %v2500_v3, %v1736_v7 }
 0x869   :  { %v1741_v5 = vpop.permute.xlu0 %1740 }
 0x86a   :  { %v1743_v6 = vmul.f32 %v2500_v3, %v1741_v5 }
 0x86c   :  { %1745 = vrot.lane.b32.xlu0 %v1743_v6, %s2611_s27 }
 0x8de   :  { %v1746_v10 = vpop.permute.xlu0 %1745 }
 0x8df   :  { %v1748_v11 = vadd.f32 %v1746_v10, %v1738_v8 }
 0x8e1   :  { %2501 = vtanh.f32 %v1748_v11 }
 0x8eb   :  { %v2502_v14 = vpop.eup %2501 }
 0x8ec   :  { %1751 = vrot.lane.b32.xlu1 %v2502_v14, %s2603_s18 }
 0x8f0   :  { %1773 = vrot.lane.b32.xlu1 %v2135_v15, %s2609_s30 }
 0x95e   :  { %v1752_v18 = vpop.permute.xlu1 %1751 }
 0x95f   :  { %v1754_v19 = vmul.f32 %v2500_v3, %v1752_v18 }
 0x961   :  { %v2155_v20 = vpack.c.bf16 %v1754_v19, %v1754_v19 }
 0x962   :  { %v1774_v21 = vpop.permute.xlu1 %1773 }
 0x963   :  { %1836 = vrot.lane.b32.xlu0 %v2155_v20, %s2611_s27  ;;  %v1785_v22 = vmul.f32 %v1774_v21, %v2952_v31  ;;  %v1786_v24 = vmul.f32 %v1774_v21, %v2948_v25  ;;  %v1776_v4 = vmul.f32 %v1774_v21, %v1754_v19  ;;  %v1787_v26 = vmul.f32 %v1774_v21, %v2963_v47 }
 0x964   :  { %v1788_v0 = vmul.f32 %v1774_v21, %v2958_v36  ;;  %v1784_v27 = vmul.f32 %v1774_v21, %v2946_v23  ;;  %v1789_v28 = vmul.f32 %v1774_v21, %v2973_v62  ;;  %v1790_v32 = vmul.f32 %v1774_v21, %v2968_v53 }
 0x965   :  { %v1800_v29 = vrot.slane %v1785_v22, 7  ;;  %v1802_v30 = vrot.slane %v1786_v24, 6  ;;  %v1791_v33 = vmul.f32 %v1774_v21, %v2979_v12  ;;  %v1804_v25 = vrot.slane %v1787_v26, 5 }
 0x966   :  { %v1806_v47 = vrot.slane %v1788_v0, 4  ;;  %v1808_v13 = vrot.slane %v1789_v28, 3  ;;  %v1810_v62 = vrot.slane %v1790_v32, 2 }
 0x967   :  { %1778 = vrot.lane.b32.xlu0 %v1776_v4, %s2611_s27  ;;  %v1801_v31 = vsel %vm372_vm2, %v1800_v29, %v1784_v27  ;;  %v1812_v38 = vrot.slane %v1791_v33, 1 }
 0x968   :  { %v1803_v34 = vsel %vm374_vm3, %v1802_v30, %v1801_v31 }
 0x969   :  { %v1805_v36 = vsel %vm376_vm4, %v1804_v25, %v1803_v34 }
 0x96a   :  { %v1807_v23 = vsel %vm378_vm5, %v1806_v47, %v1805_v36 }
 0x96b   :  { %v1809_v37 = vsel %vm380_vm6, %v1808_v13, %v1807_v23 }
 0x96c   :  { %v1811_v53 = vsel %vm382_vm7, %v1810_v62, %v1809_v37 }
 0x96d   :  { %v1813_v39 = vsel %vm384_vm8, %v1812_v38, %v1811_v53 }
 0x96e   :  { %v1815_v12 = vsel %vm1019_vm13, %v1813_v39, 0.0 }
 0x986   :  { %1816 = vadd.xlane.f32.xlu0 %v1815_v12 }
 0x99c   :  { %1586 = vrot.lane.b32.xlu0 %v3031_v44, %s2611_s27 }
 0x9a0   :  { %1762 = vrot.lane.b32.xlu0 %v1748_v11, %s2609_s30 }
 0x9d5   :  { %v1837_v40 = vpop.permute.xlu0 %1836 }
 0x9d6   :  { %1840 = vst.msk [vmem:[#allocation2] sm:$0xf] %vm1839_vm14, %v1837_v40 }
 0x9d9   :  { %v1779_v41 = vpop.permute.xlu0 %1778 }
 0x9da   :  { %v1781_v42 = vsel %vm121_vm1, %v1779_v41, 0.0 }
 0x9db   :  { %1782 = vadd.xlane.f32.xlu1 %v1781_v42 }
 0x9dd   :  { %v1875_v43 = vld [vmem:[#allocation2] sm:$0xf] }
 0x9de   :  { %2380 = vmatmul.mubr.msk.bf16.vlgmr.msra.gmra.mrb[36].mxu0 %vm121_vm1, %v1875_v43 }
 0x9ec   :  { %1591 = vrot.lane.b32.xlu1 %v3005_v35, %s2609_s30 }
 0x9f0   :  { %1756 = vrot.lane.b32.xlu1 %v1754_v19, %s2611_s27 }
 0xa13   :  { %v1817_v45 = vpop.xlane.xlu0 %1816 }
 0xa17   :  { %v1587_v46 = vpop.permute.xlu0 %1586 }
 0xa18   :  { %1589 = vst.msk [vmem:[%s3117_s13] sm:$0xff] %vm121_vm1, %v1587_v46 }
 0xa1b   :  { %v1763_v44 = vpop.permute.xlu0 %1762 }
 0xa1c   :  { %2134 = vst.msk [vmem:[%s3118_s14 + $0x8] sm:$0xff] %vm121_vm1, %v1763_v44 }
 0xa68   :  { %v1783_v48 = vpop.xlane.xlu1 %1782 }
 0xa69   :  { %v1818_v49 = vadd.f32 %v1817_v45, %v1783_v48 }
 0xa6b   :  { %v1819_v50 = vadd.f32 %v2135_v15, %v1818_v49 }
 0xa6c   :  { %v1592_v51 = vpop.permute.xlu1 %1591 }
 0xa6d   :  { %v2136_v35 = vmul.f32 -1.442695, %v1819_v50  ;;  %1594 = vst.msk [vmem:[%s3118_s14] sm:$0xff] %vm121_vm1, %v1592_v51 }
 0xa6f   :  { %2503 = vpow2.f32 %v2136_v35 }
 0xa70   :  { %v1757_v52 = vpop.permute.xlu1 %1756 }
 0xa71   :  { %2133 = vst.msk [vmem:[%s3117_s13 + $0x8] sm:$0xff] %vm121_vm1, %v1757_v52 }
 0xa79   :  { %v2504_v54 = vpop.eup %2503 }
 0xa7a   :  { %v1823_v55 = vadd.f32 1.0, %v2504_v54 }
 0xa7c   :  { %2505 = vrcp.f32 %v1823_v55 }
 0xa86   :  { %v2506_v56 = vpop.eup %2505 }
 0xa87   :  { %1827 = vrot.lane.b32.xlu1 %v2506_v56, %s2611_s27 }
 0xab1   :  { %v2007_v57 = vpop.f32.mrb[36].mxu0 }
 0xab2   :  { %v2008_v9 = vadd.f32 %v2007_v57, %v3001_v1  ;;  %v2381_v59 = vpop.f32.mrb[37].mxu0 }
 0xab3   :  { %v2010_v60 = vpop.f32.mrb[38].mxu0 }
 0xab4   :  { %v2020_v61 = vadd.f32 %v2154_v58, %v2008_v9  ;;  %v2382_v63 = vpop.f32.mrb[39].mxu0 }
 0xab6   :  { %2021 = vst [vmem:[%s3116_s12] sm:$0xff] %v2020_v61 }
 0xaf9   :  { %v1828_v2 = vpop.permute.xlu1 %1827 }
 0xafa   :  { %1831 = vst.msk [vmem:[%s3119_s15] sm:$0xff] %vm1830_vm15, %v1828_v2 }
 0xafb   :  { %2042 = vsyncpa [#allocation5], 1 }
 0xafc   :  { %2043 = vsyncpa [#allocation7], 1 }
 0xafd   :  { %2044 = vsyncpa [#allocation10], 1 }

</bundles_post_ra>
